<compile_context>
chip_gen: v7x
topology: tpu7x:2x2x1
jax: 0.10.0
libtpu: 0.0.40
codegen_flags: <defaults>
</compile_context>

<pallas_src>
import jax
import jax.numpy as jnp
import numpy as np
from jax.experimental import pallas as pl
from jax.experimental.pallas import tpu as pltpu


def _round_up(x, m):
    return ((x + m - 1) // m) * m


# ----------------------------- kernels -----------------------------

def _gcn_single_block_kernel(adj_ref, xw_ref, out_ref):
    # Whole problem resident in VMEM: one bf16 MXU matmul with f32 accumulate,
    # tanh fused on the way out (EUP slot, effectively free).
    out_ref[...] = jnp.tanh(
        jnp.dot(adj_ref[...], xw_ref[...], preferred_element_type=jnp.float32)
    ).astype(out_ref.dtype)


def _gcn_tiled_kernel(adj_ref, xw_ref, out_ref, acc_ref):
    k = pl.program_id(2)

    @pl.when(k == 0)
    def _init():
        acc_ref[...] = jnp.zeros_like(acc_ref)

    # bf16 operands on the MXU, f32 accumulation resident in VMEM scratch.
    acc_ref[...] += jnp.dot(
        adj_ref[...], xw_ref[...], preferred_element_type=jnp.float32
    )

    @pl.when(k == pl.num_programs(2) - 1)
    def _finalize():
        out_ref[...] = jnp.tanh(acc_ref[...]).astype(out_ref.dtype)


# ----------------------------- wrappers -----------------------------

def prepare_adj(adj):
    """Pad adjacency to a multiple of 128 and cast to bf16 ONCE (hoisted out of the step)."""
    n = adj.shape[0]
    assert adj.shape == (n, n)
    n_pad = _round_up(max(n, 128), 128)
    return jnp.pad(adj.astype(jnp.bfloat16), ((0, n_pad - n), (0, n_pad - n)))


def _pick_tile(dim_pad):
    for t in (512, 256, 128):
        if dim_pad % t == 0:
            return t
    return dim_pad  # unreachable: dim_pad is always a multiple of 128


def graph_conv_sparse(adj_p, inputs, weight, *, force_tiled=False):
    """tanh(adj @ (inputs @ weight)).

    adj_p:  bf16 [n_pad, n_pad] padded adjacency from prepare_adj().
    inputs: [n, d_in] float; weight: [d_in, d_out] float.
    Returns f32 [n, d_out].
    """
    n, d_in = inputs.shape
    d_in_w, d_out = weight.shape
    assert d_in_w == d_in
    n_pad = adj_p.shape[0]
    assert adj_p.shape == (n_pad, n_pad) and n_pad >= n and n_pad % 128 == 0

    dout_pad = _round_up(d_out, 128)

    # Stage 1 hoisted out of the kernel: tiny f32 matmul in XLA, single bf16 cast.
    xw = jnp.dot(inputs.astype(jnp.float32), weight.astype(jnp.float32),
                 preferred_element_type=jnp.float32)
    xw_p = jnp.pad(xw, ((0, n_pad - n), (0, dout_pad - d_out))).astype(jnp.bfloat16)

    adj_bytes = n_pad * n_pad * 2
    xw_bytes = n_pad * dout_pad * 2
    out_bytes = n_pad * dout_pad * 4

    if not force_tiled and adj_bytes + xw_bytes + out_bytes <= 8 * 1024 * 1024:
        # ---- small-graph fast path: single block, no grid, no per-step overhead ----
        out_p = pl.pallas_call(
            _gcn_single_block_kernel,
            out_shape=jax.ShapeDtypeStruct((n_pad, dout_pad), jnp.float32),
            compiler_params=pltpu.CompilerParams(vmem_limit_bytes=32 * 1024 * 1024),
        )(adj_p, xw_p)
        return out_p[:n, :d_out]

    # ---- tiled path for large graphs ----
    tm = tk = _pick_tile(n_pad)
    # Keep the j-extent 1 whenever d_out is modest so adj is read from HBM exactly once.
    tn = dout_pad if dout_pad <= 1024 else _pick_tile(dout_pad)
    assert tm % 8 == 0 and tk % 128 == 0 and tn % 128 == 0

    grid = (n_pad // tm, dout_pad // tn, n_pad // tk)

    out_p = pl.pallas_call(
        _gcn_tiled_kernel,
        out_shape=jax.ShapeDtypeStruct((n_pad, dout_pad), jnp.float32),
        grid_spec=pltpu.PrefetchScalarGridSpec(
            num_scalar_prefetch=0,
            grid=grid,
            in_specs=[
                # adj tile: the dominant HBM stream; deeper buffering hides DMA jitter.
                pl.BlockSpec((tm, tk), lambda i, j, k: (i, k),
                             pipeline_mode=pl.Buffered(3)),
                # precomputed XW tile for this (k, j) block (bf16).
                pl.BlockSpec((tk, tn), lambda i, j, k: (k, j)),
            ],
            out_specs=pl.BlockSpec((tm, tn), lambda i, j, k: (i, j)),
            scratch_shapes=[pltpu.VMEM((tm, tn), jnp.float32)],
        ),
        compiler_params=pltpu.CompilerParams(
            dimension_semantics=("parallel", "parallel", "arbitrary"),
            vmem_limit_bytes=64 * 1024 * 1024,
        ),
    )(adj_p, xw_p)

    return out_p[:n, :d_out]


if __name__ == "__main__":
    key = jax.random.PRNGKey(0)
    k_adj, k_x, k_w = jax.random.split(key, 3)

    # Small graph, hidden_dim=32 as in the original script's defaults.
    n_nodes, d_in, d_out = 640, 96, 32

    # Random symmetric adjacency with self-loops, row-normalized (typical GCN input).
    a = (jax.random.uniform(k_adj, (n_nodes, n_nodes)) < 0.05).astype(jnp.float32)
    a = jnp.maximum(a, a.T) + jnp.eye(n_nodes, dtype=jnp.float32)
    adj = a / jnp.sum(a, axis=1, keepdims=True)

    inputs = jax.random.normal(k_x, (n_nodes, d_in), jnp.float32)
    init_range = float(np.sqrt(6.0 / (d_in + d_out)))
    weight = jax.random.uniform(
        k_w, (d_in, d_out), jnp.float32, -init_range, init_range
    )

    # Pad/cast the (fixed) adjacency once, outside the "training step".
    adj_p = prepare_adj(adj)

    ref = jnp.tanh(adj @ (inputs @ weight))

    # Small-graph single-block path (the one that fires at this size).
    out = jax.block_until_ready(graph_conv_sparse(adj_p, inputs, weight))
    assert out.shape == (n_nodes, d_out)
    np.testing.assert_allclose(np.asarray(out), np.asarray(ref), atol=5e-2, rtol=5e-2)

    # Also exercise the tiled large-graph path on the same data (correctness check).
    out_t = jax.block_until_ready(
        graph_conv_sparse(adj_p, inputs, weight, force_tiled=True)
    )
    np.testing.assert_allclose(np.asarray(out_t), np.asarray(ref), atol=5e-2, rtol=5e-2)

    print("KERNEL_OK")
</pallas_src>

<mosaic_0001>
module attributes {stable_mosaic.version = 11 : i64} {
  func.func @_gcn_single_block_kernel(%arg0: memref<640x640xbf16, #tpu.memory_space<vmem>>, %arg1: memref<640x128xbf16, #tpu.memory_space<vmem>>, %arg2: memref<640x128xf32, #tpu.memory_space<vmem>>) attributes {dimension_semantics = [], scalar_prefetch = 0 : i64, scratch_operands = 0 : i64, tpu.core_type = #tpu.core_type<tc>} {
    %c0 = arith.constant 0 : index
    %c0_0 = arith.constant 0 : index
    %0 = vector.load %arg0[%c0, %c0_0] : memref<640x640xbf16, #tpu.memory_space<vmem>>, vector<640x640xbf16>
    %c0_1 = arith.constant 0 : index
    %c0_2 = arith.constant 0 : index
    %1 = vector.load %arg1[%c0_1, %c0_2] : memref<640x128xbf16, #tpu.memory_space<vmem>>, vector<640x128xbf16>
    %cst = arith.constant dense<0.000000e+00> : vector<640x128xf32>
    %2 = tpu.matmul %0, %1, %cst {dimension_numbers = #tpu.dot_dimension_numbers<[1], [0], [0], [1], [0, 0, 1, 1], [], []>} : vector<640x640xbf16>, vector<640x128xbf16>, vector<640x128xf32> -> vector<640x128xf32>
    %3 = math.tanh %2 : vector<640x128xf32>
    %c0_3 = arith.constant 0 : index
    %c0_4 = arith.constant 0 : index
    %4 = vector.load %arg2[%c0_3, %c0_4] : memref<640x128xf32, #tpu.memory_space<vmem>>, vector<640x128xf32>
    tpu.vector_store %arg2[%c0_3, %c0_4], %3 {strides = array<i32>} : memref<640x128xf32, #tpu.memory_space<vmem>>, vector<640x128xf32>,
    return
  }
}

</mosaic_0001>

<bundles_post_ra>
// kernel: tpu_custom_call.1
= control target key start
LH: loop header
LB: loop body
LE: loop exit
PB: predicated region body
PF: predicated region fallthrough
CT: control target
= control target key end

     0   :  { %7 = vsyncpa [#allocation3], 0  ;;  %s4455_s0 = inlined_call_operand.hbm [shape: bf16[640,640], index: 0, kind: input, shape index: {}]   ;;  %s4456_s1 = inlined_call_operand.hbm [shape: bf16[640,128], index: 1, kind: input, shape index: {}]   ;;  %s4457_s2 = inlined_call_operand.hbm [shape: f32[640,128], index: 2, kind: output, shape index: {}]  }
   0x1   :  { %8 = vsyncpa [#allocation6], 0 }
   0x2   :  { %9 = vsyncpa [#allocation4], 0  ;;  %s3956_s9 = smov [#allocation2]   ;;  %s3884_s13 = scalar_lea.hbm %s4455_s0, 25600 }
   0x3   :  { %s15_s10 = sshll.u32 %s3956_s9, 4  ;;  %p3885_p0 = scmp.ne.s32.totalorder %s4455_s0, %s3884_s13  ;;  %s16_s10 = int_to_ptr.vmem [resolvable:$true] %s15_s10 }
   0x4   :  { %p3888_p1 = scmp.lt.u32.totalorder %s3884_s13, %s4455_s0 }
   0x6   :  { %p3890_p2 = pnand %p3888_p1, %p3885_p0 }
   0x8   :  { %3893 = shalt.err (!%p3890_p2)
}
   0x9   :  { %s3894_s18 = scalar_lea.vmem %s16_s10, 25600  ;;  %p3899_p4 = scmp.lt.s32.totalorder %s16_s10, %s16_s10 }
   0xa   :  { %p3895_p3 = scmp.ne.s32.totalorder %s16_s10, %s3894_s18  ;;  %p3900_p5 = scmp.lt.s32.totalorder %s3894_s18, %s3894_s18 }
   0xc   :  { %p3901_p6 = por %p3900_p5, %p3899_p4 }
   0xe   :  { %p3902_p7 = pnand %p3901_p6, %p3895_p3 }
  0x10   :  { %3905 = shalt.err (!%p3902_p7)
}
  0x11   :  { %s3957_s19 = smov 320   ;;  %s3958_s20 = smov 20  }
  0x12   :  { %21 = dma.hbm_to_vmem [thread:$0]  %s4455_s0, 25600, %s16_s10, [#allocation3], %s3957_s19, %s3957_s19, %s3958_s20  }
  0x13   :  { %s3959_s23 = smov [#allocation5]   ;;  %s3906_s27 = scalar_lea.hbm %s4456_s1, 5120 }
  0x14   :  { %s27_s24 = sshll.u32 %s3959_s23, 4  ;;  %p3907_p8 = scmp.ne.s32.totalorder %s4456_s1, %s3906_s27  ;;  %s28_s24 = int_to_ptr.vmem [resolvable:$true] %s27_s24 }
  0x15   :  { %p3910_p9 = scmp.lt.u32.totalorder %s3906_s27, %s4456_s1 }
  0x17   :  { %p3912_p10 = pnand %p3910_p9, %p3907_p8 }
  0x19   :  { %3915 = shalt.err (!%p3912_p10)
}
  0x1a   :  { %s3916_s4 = scalar_lea.vmem %s28_s24, 5120  ;;  %p3921_p12 = scmp.lt.s32.totalorder %s28_s24, %s28_s24 }
  0x1b   :  { %p3917_p11 = scmp.ne.s32.totalorder %s28_s24, %s3916_s4  ;;  %p3922_p13 = scmp.lt.s32.totalorder %s3916_s4, %s3916_s4 }
  0x1d   :  { %p3923_p0 = por %p3922_p13, %p3921_p12 }
  0x1f   :  { %p3924_p1 = pnand %p3923_p0, %p3917_p11 }
  0x21   :  { %3927 = shalt.err (!%p3924_p1)
}
  0x22   :  { %s3960_s0 = smov 64   ;;  %s3961_s5 = smov 4  }
  0x23   :  { %33 = dma.hbm_to_vmem [thread:$0]  %s4456_s1, 5120, %s28_s24, [#allocation6], %s3960_s0, %s3960_s0, %s3961_s5  }
  0x24   :  { %3950 = dma.done.wait [#allocation3], 25600  }
  0x25   :  { %3951 = vsyncadd [#allocation3], 4294941696 }
  0x26   :  { %3952 = dma.done.wait [#allocation6], 5120  }
  0x27   :  { %3953 = vsyncadd [#allocation6], 4294962176  ;;  %v3962_v0 = vmov 0   ;;  %v3404_v1 = vld [vmem:[#allocation5] sm:$0xff]   ;;  %v3405_v2 = vld [vmem:[#allocation5 + $0x8] sm:$0xff]   ;;  %s3963_s1 = smov [#allocation7]  }
  0x28   :  { %1641 = vmatprep.subr.bf16.mxu0 %v3962_v0  ;;  %3262 = vmatprep.subr.bf16.mxu1 %v3962_v0  ;;  %v3406_v3 = vld [vmem:[#allocation5 + $0x10] sm:$0xff]   ;;  %v3407_v4 = vld [vmem:[#allocation5 + $0x18] sm:$0xff]   ;;  %v3408_v5 = vld [vmem:[#allocation5 + $0x20] sm:$0xff]   ;;  %s2865_s8 = sshll.u32 %s3963_s1, 4  ;;  %s2866_s8 = int_to_ptr.vmem [resolvable:$true] %s2865_s8 }
  0x29   :  { %1642 = vmatpush1.bf16.msra.mxu0 %v3404_v1  ;;  %3278 = vmatpush1.bf16.msra.mxu1 %v3404_v1  ;;  %v3422_v6 = vld [vmem:[#allocation2 + $0x4] ss:$20 sps:$4 sm:$0xff]   ;;  %v3409_v7 = vld [vmem:[#allocation5 + $0x28] sm:$0xff]   ;;  %v3410_v9 = vld [vmem:[#allocation5 + $0x30] sm:$0xff]   ;;  %s3928_s9 = scalar_lea.vmem %s2866_s8, 10240  ;;  %p3933_p3 = scmp.lt.s32.totalorder %s2866_s8, %s2866_s8 }
  0x2a   :  { %1643 = vmatprep.subr.bf16.mxu0 %v3962_v0  ;;  %3263 = vmatprep.subr.bf16.mxu1 %v3962_v0  ;;  %v3425_v8 = vld [vmem:[#allocation2 + $0x194] ss:$20 sps:$4 sm:$0xff]   ;;  %v3411_v10 = vld [vmem:[#allocation5 + $0x38] sm:$0xff]   ;;  %v3412_v11 = vld [vmem:[#allocation5 + $0x40] sm:$0xff]   ;;  %p3929_p2 = scmp.ne.s32.totalorder %s2866_s8, %s3928_s9  ;;  %p3934_p4 = scmp.lt.s32.totalorder %s3928_s9, %s3928_s9 }
  0x2b   :  { %1673 = vmatprep.mubr.bf16.mxu0 %v3422_v6  ;;  %1753 = vmatprep.mubr.bf16.mxu1 %v3425_v8  ;;  %v3413_v12 = vld [vmem:[#allocation5 + $0x48] sm:$0xff]   ;;  %v3414_v13 = vld [vmem:[#allocation5 + $0x50] sm:$0xff]   ;;  %v3415_v14 = vld [vmem:[#allocation5 + $0x58] sm:$0xff]  }
  0x2c   :  { %v3416_v15 = vld [vmem:[#allocation5 + $0x60] sm:$0xff]   ;;  %v3417_v16 = vld [vmem:[#allocation5 + $0x68] sm:$0xff]   ;;  %v3418_v17 = vld [vmem:[#allocation5 + $0x70] sm:$0xff]   ;;  %p3935_p5 = por %p3934_p4, %p3933_p3 }
  0x2d   :  { %1644 = vmatpush1.bf16.msra.mxu0 %v3405_v2  ;;  %3279 = vmatpush1.bf16.msra.mxu1 %v3405_v2  ;;  %v3419_v18 = vld [vmem:[#allocation5 + $0x78] sm:$0xff]   ;;  %v3427_v19 = vld [vmem:[#allocation5 + $0x100] sm:$0xff]   ;;  %v3456_v25 = vld [vmem:[#allocation5 + $0x108] sm:$0xff]  }
  0x2e   :  { %1645 = vmatprep.subr.bf16.mxu0 %v3962_v0  ;;  %3264 = vmatprep.subr.bf16.mxu1 %v3962_v0  ;;  %v3420_v20 = vld [vmem:[#allocation2] ss:$20 sps:$4 sm:$0xff]   ;;  %v3423_v21 = vld [vmem:[#allocation2 + $0x190] ss:$20 sps:$4 sm:$0xff]   ;;  %v3428_v26 = vld [vmem:[#allocation5 + $0x88] sm:$0xff]   ;;  %p3936_p6 = pnand %p3935_p5, %p3929_p2 }
  0x2f   :  { %v3426_v22 = vld [vmem:[#allocation5 + $0x80] sm:$0xff]   ;;  %v3431_v24 = vld [vmem:[#allocation2 + $0x1bc] ss:$20 sps:$4 sm:$0xff]   ;;  %v3434_v29 = vld [vmem:[#allocation2 + $0x1b8] ss:$20 sps:$4 sm:$0xff]  }
  0x30   :  { %v3429_v23 = vld [vmem:[#allocation2 + $0x2c] ss:$20 sps:$4 sm:$0xff]   ;;  %v3483_v27 = vld [vmem:[#allocation5 + $0x110] sm:$0xff]   ;;  %v3433_v28 = vld [vmem:[#allocation2 + $0x28] ss:$20 sps:$4 sm:$0xff]  }
  0x31   :  { %1646 = vmatpush1.bf16.msra.mxu0 %v3406_v3  ;;  %3280 = vmatpush1.bf16.msra.mxu1 %v3406_v3  ;;  %v3435_v30 = vld [vmem:[#allocation5 + $0x90] sm:$0xff]   ;;  %v3438_v32 = vld [vmem:[#allocation2 + $0x1e4] ss:$20 sps:$4 sm:$0xff]   ;;  %v3446_v39 = vld [vmem:[#allocation2 + $0x20c] ss:$20 sps:$4 sm:$0xff]  }
  0x32   :  { %1647 = vmatprep.subr.bf16.mxu0 %v3962_v0  ;;  %3265 = vmatprep.subr.bf16.mxu1 %v3962_v0  ;;  %v3436_v31 = vld [vmem:[#allocation2 + $0x54] ss:$20 sps:$4 sm:$0xff]   ;;  %v3511_v33 = vld [vmem:[#allocation5 + $0x118] sm:$0xff]   ;;  %v3440_v35 = vld [vmem:[#allocation2 + $0x50] ss:$20 sps:$4 sm:$0xff]  }
  0x33   :  { %v3442_v34 = vld [vmem:[#allocation5 + $0x98] sm:$0xff]   ;;  %v3441_v36 = vld [vmem:[#allocation2 + $0x1e0] ss:$20 sps:$4 sm:$0xff]   ;;  %v3450_v41 = vld [vmem:[#allocation5 + $0xa8] sm:$0xff]  }
  0x34   :  { %v3443_v37 = vld [vmem:[#allocation5 + $0xa0] sm:$0xff]   ;;  %v3444_v38 = vld [vmem:[#allocation2 + $0x7c] ss:$20 sps:$4 sm:$0xff]   ;;  %v3448_v42 = vld [vmem:[#allocation2 + $0x78] ss:$20 sps:$4 sm:$0xff]  }
  0x35   :  { %1648 = vmatpush1.bf16.msra.mxu0 %v3407_v4  ;;  %3281 = vmatpush1.bf16.msra.mxu1 %v3407_v4  ;;  %v3536_v40 = vld [vmem:[#allocation5 + $0x120] sm:$0xff]   ;;  %v3449_v43 = vld [vmem:[#allocation2 + $0x208] ss:$20 sps:$4 sm:$0xff]   ;;  %v3455_v46 = vld [vmem:[#allocation5 + $0xb0] sm:$0xff]  }
  0x36   :  { %1649 = vmatprep.subr.bf16.mxu0 %v3962_v0  ;;  %3266 = vmatprep.subr.bf16.mxu1 %v3962_v0  ;;  %v3451_v44 = vld [vmem:[#allocation2 + $0xa4] ss:$20 sps:$4 sm:$0xff]   ;;  %v3453_v45 = vld [vmem:[#allocation2 + $0x234] ss:$20 sps:$4 sm:$0xff]   ;;  %v3460_v51 = vld [vmem:[#allocation2 + $0xcc] ss:$20 sps:$4 sm:$0xff]  }
  0x37   :  { %v3559_v47 = vld [vmem:[#allocation5 + $0x128] sm:$0xff]   ;;  %v3457_v48 = vld [vmem:[#allocation2 + $0xa0] ss:$20 sps:$4 sm:$0xff]   ;;  %v3459_v49 = vld [vmem:[#allocation5 + $0xb8] sm:$0xff]  }
  0x38   :  { %v3458_v50 = vld [vmem:[#allocation2 + $0x230] ss:$20 sps:$4 sm:$0xff]   ;;  %v3467_v54 = vld [vmem:[#allocation5 + $0xc8] sm:$0xff]   ;;  %v3481_v60 = vld [vmem:[#allocation5 + $0xd8] sm:$0xff]  }
  0x39   :  { %1650 = vmatpush1.bf16.msra.mxu0 %v3408_v5  ;;  %3282 = vmatpush1.bf16.msra.mxu1 %v3408_v5  ;;  %v3462_v52 = vld [vmem:[#allocation2 + $0x25c] ss:$20 sps:$4 sm:$0xff]   ;;  %v3466_v53 = vld [vmem:[#allocation5 + $0xc0] sm:$0xff]   ;;  %v3465_v56 = vld [vmem:[#allocation2 + $0x258] ss:$20 sps:$4 sm:$0xff]  }
  0x3a   :  { %1651 = vmatprep.subr.bf16.mxu0 %v3962_v0  ;;  %3267 = vmatprep.subr.bf16.mxu1 %v3962_v0  ;;  %v3464_v55 = vld [vmem:[#allocation2 + $0xc8] ss:$20 sps:$4 sm:$0xff]   ;;  %v3470_v58 = vld [vmem:[#allocation2 + $0x284] ss:$20 sps:$4 sm:$0xff]   ;;  %v3474_v59 = vld [vmem:[#allocation5 + $0xd0] sm:$0xff]  }
  0x3b   :  { %v3468_v57 = vld [vmem:[#allocation2 + $0xf4] ss:$20 sps:$4 sm:$0xff]   ;;  %v3472_v61 = vld [vmem:[#allocation2 + $0xf0] ss:$20 sps:$4 sm:$0xff]   ;;  %v3477_v1 = vld [vmem:[#allocation2 + $0x2ac] ss:$20 sps:$4 sm:$0xff]  }
  0x3c   :  { %v3473_v62 = vld [vmem:[#allocation2 + $0x280] ss:$20 sps:$4 sm:$0xff]   ;;  %v3475_v63 = vld [vmem:[#allocation2 + $0x11c] ss:$20 sps:$4 sm:$0xff]   ;;  %v3490_v4 = vld [vmem:[#allocation5 + $0xe8] sm:$0xff]  }
  0x3d   :  { %1652 = vmatpush1.bf16.msra.mxu0 %v3409_v7  ;;  %3283 = vmatpush1.bf16.msra.mxu1 %v3409_v7  ;;  %v3482_v2 = vld [vmem:[#allocation5 + $0xe0] sm:$0xff]   ;;  %v3580_v3 = vld [vmem:[#allocation5 + $0x130] sm:$0xff]   ;;  %v3479_v5 = vld [vmem:[#allocation2 + $0x118] ss:$20 sps:$4 sm:$0xff]  }
  0x3e   :  { %1653 = vmatprep.subr.bf16.mxu0 %v3962_v0  ;;  %3268 = vmatprep.subr.bf16.mxu1 %v3962_v0  ;;  %v3480_v6 = vld [vmem:[#allocation2 + $0x2a8] ss:$20 sps:$4 sm:$0xff]   ;;  %v3484_v7 = vld [vmem:[#allocation2 + $0x144] ss:$20 sps:$4 sm:$0xff]  }
  0x3f   :  { %v3486_v8 = vld [vmem:[#allocation2 + $0x2d4] ss:$20 sps:$4 sm:$0xff]  }
  0x41   :  { %1654 = vmatpush1.bf16.msra.mxu0 %v3410_v9  ;;  %3284 = vmatpush1.bf16.msra.mxu1 %v3410_v9  ;;  %v3495_v9 = vld [vmem:[#allocation5 + $0xf0] sm:$0xff]  }
  0x42   :  { %1655 = vmatprep.subr.bf16.mxu0 %v3962_v0  ;;  %3269 = vmatprep.subr.bf16.mxu1 %v3962_v0 }
  0x45   :  { %1656 = vmatpush1.bf16.msra.mxu0 %v3411_v10  ;;  %3285 = vmatpush1.bf16.msra.mxu1 %v3411_v10  ;;  %v3498_v10 = vld [vmem:[#allocation5 + $0xf8] sm:$0xff]  }
  0x46   :  { %1657 = vmatprep.subr.bf16.mxu0 %v3962_v0  ;;  %3270 = vmatprep.subr.bf16.mxu1 %v3962_v0 }
  0x49   :  { %1658 = vmatpush1.bf16.msra.mxu0 %v3412_v11  ;;  %3286 = vmatpush1.bf16.msra.mxu1 %v3412_v11  ;;  %v3488_v11 = vld [vmem:[#allocation2 + $0x140] ss:$20 sps:$4 sm:$0xff]  }
  0x4a   :  { %1659 = vmatprep.subr.bf16.mxu0 %v3962_v0  ;;  %3271 = vmatprep.subr.bf16.mxu1 %v3962_v0 }
  0x4d   :  { %1660 = vmatpush1.bf16.msra.mxu0 %v3413_v12  ;;  %3287 = vmatpush1.bf16.msra.mxu1 %v3413_v12  ;;  %v3489_v12 = vld [vmem:[#allocation2 + $0x2d0] ss:$20 sps:$4 sm:$0xff]  }
  0x4e   :  { %1661 = vmatprep.subr.bf16.mxu0 %v3962_v0  ;;  %3272 = vmatprep.subr.bf16.mxu1 %v3962_v0 }
  0x51   :  { %1662 = vmatpush1.bf16.msra.mxu0 %v3414_v13  ;;  %3288 = vmatpush1.bf16.msra.mxu1 %v3414_v13  ;;  %v3491_v13 = vld [vmem:[#allocation2 + $0x16c] ss:$20 sps:$4 sm:$0xff]  }
  0x52   :  { %1663 = vmatprep.subr.bf16.mxu0 %v3962_v0  ;;  %3273 = vmatprep.subr.bf16.mxu1 %v3962_v0 }
  0x55   :  { %1664 = vmatpush1.bf16.msra.mxu0 %v3415_v14  ;;  %3289 = vmatpush1.bf16.msra.mxu1 %v3415_v14  ;;  %v3493_v14 = vld [vmem:[#allocation2 + $0x2fc] ss:$20 sps:$4 sm:$0xff]  }
  0x56   :  { %1665 = vmatprep.subr.bf16.mxu0 %v3962_v0  ;;  %3274 = vmatprep.subr.bf16.mxu1 %v3962_v0 }
  0x59   :  { %1666 = vmatpush1.bf16.msra.mxu0 %v3416_v15  ;;  %3290 = vmatpush1.bf16.msra.mxu1 %v3416_v15  ;;  %v3496_v15 = vld [vmem:[#allocation2 + $0x168] ss:$20 sps:$4 sm:$0xff]  }
  0x5a   :  { %1667 = vmatprep.subr.bf16.mxu0 %v3962_v0  ;;  %3275 = vmatprep.subr.bf16.mxu1 %v3962_v0 }
  0x5d   :  { %1668 = vmatpush1.bf16.msra.mxu0 %v3417_v16  ;;  %3291 = vmatpush1.bf16.msra.mxu1 %v3417_v16  ;;  %v3497_v16 = vld [vmem:[#allocation2 + $0x2f8] ss:$20 sps:$4 sm:$0xff]  }
  0x5e   :  { %1669 = vmatprep.subr.bf16.mxu0 %v3962_v0  ;;  %3276 = vmatprep.subr.bf16.mxu1 %v3962_v0 }
  0x61   :  { %1670 = vmatpush1.bf16.msra.mxu0 %v3418_v17  ;;  %3292 = vmatpush1.bf16.msra.mxu1 %v3418_v17  ;;  %v3499_v17 = vld [vmem:[#allocation2 + $0x324] ss:$20 sps:$4 sm:$0xff]  }
  0x62   :  { %1671 = vmatprep.subr.bf16.mxu0 %v3962_v0  ;;  %3277 = vmatprep.subr.bf16.mxu1 %v3962_v0 }
  0x65   :  { %1672 = vmatpush1.bf16.msra.mxu0 %v3419_v18  ;;  %3293 = vmatpush1.bf16.msra.mxu1 %v3419_v18  ;;  %v3503_v18 = vld [vmem:[#allocation2 + $0xc] ss:$20 sps:$4 sm:$0xff]  }
  0x66   :  { %1994 = vmatprep.subr.bf16.mxu0 %v3962_v0  ;;  %3166 = vmatprep.subr.bf16.mxu1 %v3427_v19 }
  0x68   :  { %1674 = vmatmul.mubr.bf16.vlgmr.msra.gmra.mrb[0].mxu0 %v3420_v20  ;;  %1754 = vmatmul.mubr.bf16.vlgmr.msra.gmra.mrb[0].mxu1 %v3423_v21  ;;  %v3504_v20 = vld [vmem:[#allocation2 + $0x320] ss:$20 sps:$4 sm:$0xff]  }
  0x69   :  { %1995 = vmatpush1.bf16.msra.mxu0 %v3426_v22  ;;  %3167 = vmatpush3.bf16.msra.mxu1 %v3427_v19  ;;  %v3501_v19 = vld [vmem:[#allocation2 + $0x8] ss:$20 sps:$4 sm:$0xff]   ;;  %v3505_v21 = vld [vmem:[#allocation2 + $0x34c] ss:$20 sps:$4 sm:$0xff]  }
  0x6a   :  { %1996 = vmatprep.subr.bf16.mxu0 %v3962_v0  ;;  %1681 = vmatprep.mubr.bf16.mxu0 %v3429_v23  ;;  %v3507_v22 = vld [vmem:[#allocation2 + $0x34] ss:$20 sps:$4 sm:$0xff]   ;;  %v3510_v23 = vld [vmem:[#allocation2 + $0x30] ss:$20 sps:$4 sm:$0xff]  }
  0x6b   :  { %1761 = vmatprep.mubr.bf16.mxu1 %v3431_v24  ;;  %3168 = vmatprep.subr.bf16.mxu1 %v3456_v25  ;;  %v3605_v24 = vld [vmem:[#allocation5 + $0x138] sm:$0xff]  }
  0x6d   :  { %1997 = vmatpush1.bf16.msra.mxu0 %v3428_v26  ;;  %3169 = vmatpush3.bf16.msra.mxu1 %v3456_v25  ;;  %v3512_v25 = vld [vmem:[#allocation2 + $0x374] ss:$20 sps:$4 sm:$0xff]   ;;  %v3514_v26 = vld [vmem:[#allocation2 + $0x5c] ss:$20 sps:$4 sm:$0xff]  }
  0x6e   :  { %1998 = vmatprep.subr.bf16.mxu0 %v3962_v0  ;;  %3170 = vmatprep.subr.bf16.mxu1 %v3483_v27 }
  0x70   :  { %1682 = vmatmul.mubr.bf16.gmra.mrb[4].mxu0 %v3433_v28  ;;  %1762 = vmatmul.mubr.bf16.gmra.mrb[4].mxu1 %v3434_v29  ;;  %v3517_v28 = vld [vmem:[#allocation2 + $0x58] ss:$20 sps:$4 sm:$0xff]   ;;  %v3518_v29 = vld [vmem:[#allocation2 + $0x39c] ss:$20 sps:$4 sm:$0xff]  }
  0x71   :  { %1999 = vmatpush1.bf16.msra.mxu0 %v3435_v30  ;;  %1689 = vmatprep.mubr.bf16.mxu0 %v3436_v31  ;;  %v3520_v30 = vld [vmem:[#allocation2 + $0x84] ss:$20 sps:$4 sm:$0xff]  }
  0x72   :  { %1769 = vmatprep.mubr.bf16.mxu1 %v3438_v32  ;;  %2000 = vmatprep.subr.bf16.mxu0 %v3962_v0  ;;  %v3522_v31 = vld [vmem:[#allocation2 + $0x398] ss:$20 sps:$4 sm:$0xff]   ;;  %v3523_v32 = vld [vmem:[#allocation2 + $0x80] ss:$20 sps:$4 sm:$0xff]  }
  0x73   :  { %3171 = vmatpush3.bf16.msra.mxu1 %v3483_v27  ;;  %v3516_v27 = vld [vmem:[#allocation2 + $0x370] ss:$20 sps:$4 sm:$0xff]  }
  0x74   :  { %3172 = vmatprep.subr.bf16.mxu1 %v3511_v33 }
  0x75   :  { %2001 = vmatpush1.bf16.msra.mxu0 %v3442_v34  ;;  %v3526_v34 = vld [vmem:[#allocation2 + $0xac] ss:$20 sps:$4 sm:$0xff]  }
  0x76   :  { %2002 = vmatprep.subr.bf16.mxu0 %v3962_v0 }
  0x77   :  { %3173 = vmatpush3.bf16.msra.mxu1 %v3511_v33  ;;  %v3524_v33 = vld [vmem:[#allocation2 + $0x3c4] ss:$20 sps:$4 sm:$0xff]  }
  0x78   :  { %1690 = vmatmul.mubr.bf16.gmra.mrb[8].mxu0 %v3440_v35  ;;  %1770 = vmatmul.mubr.bf16.gmra.mrb[8].mxu1 %v3441_v36  ;;  %v3528_v35 = vld [vmem:[#allocation2 + $0x3c0] ss:$20 sps:$4 sm:$0xff]   ;;  %v3529_v36 = vld [vmem:[#allocation2 + $0xa8] ss:$20 sps:$4 sm:$0xff]  }
  0x79   :  { %2003 = vmatpush1.bf16.msra.mxu0 %v3443_v37  ;;  %1697 = vmatprep.mubr.bf16.mxu0 %v3444_v38  ;;  %v3530_v37 = vld [vmem:[#allocation2 + $0x3ec] ss:$20 sps:$4 sm:$0xff]   ;;  %v3532_v38 = vld [vmem:[#allocation2 + $0xd4] ss:$20 sps:$4 sm:$0xff]  }
  0x7a   :  { %1777 = vmatprep.mubr.bf16.mxu1 %v3446_v39  ;;  %2004 = vmatprep.subr.bf16.mxu0 %v3962_v0  ;;  %v3534_v39 = vld [vmem:[#allocation2 + $0x3e8] ss:$20 sps:$4 sm:$0xff]  }
  0x7b   :  { %3174 = vmatprep.subr.bf16.mxu1 %v3536_v40 }
  0x7c   :  { %3175 = vmatpush3.bf16.msra.mxu1 %v3536_v40  ;;  %v3535_v40 = vld [vmem:[#allocation2 + $0xd0] ss:$20 sps:$4 sm:$0xff]  }
  0x7d   :  { %2005 = vmatpush1.bf16.msra.mxu0 %v3450_v41  ;;  %3176 = vmatprep.subr.bf16.mxu1 %v3559_v47  ;;  %v3537_v41 = vld [vmem:[#allocation2 + $0x414] ss:$20 sps:$4 sm:$0xff]  }
  0x7e   :  { %2006 = vmatprep.subr.bf16.mxu0 %v3962_v0 }
  0x80   :  { %1698 = vmatmul.mubr.bf16.gmra.mrb[12].mxu0 %v3448_v42  ;;  %1778 = vmatmul.mubr.bf16.gmra.mrb[12].mxu1 %v3449_v43  ;;  %v3539_v42 = vld [vmem:[#allocation2 + $0xfc] ss:$20 sps:$4 sm:$0xff]  }
  0x81   :  { %1705 = vmatprep.mubr.bf16.mxu0 %v3451_v44  ;;  %1785 = vmatprep.mubr.bf16.mxu1 %v3453_v45  ;;  %v3541_v43 = vld [vmem:[#allocation2 + $0x410] ss:$20 sps:$4 sm:$0xff]   ;;  %v3542_v44 = vld [vmem:[#allocation2 + $0xf8] ss:$20 sps:$4 sm:$0xff]  }
  0x82   :  { %2007 = vmatpush1.bf16.msra.mxu0 %v3455_v46  ;;  %3177 = vmatpush3.bf16.msra.mxu1 %v3559_v47  ;;  %v3543_v45 = vld [vmem:[#allocation2 + $0x43c] ss:$20 sps:$4 sm:$0xff]   ;;  %v3545_v46 = vld [vmem:[#allocation2 + $0x124] ss:$20 sps:$4 sm:$0xff]  }
  0x83   :  { %2008 = vmatprep.subr.bf16.mxu0 %v3962_v0  ;;  %3178 = vmatprep.subr.bf16.mxu1 %v3580_v3  ;;  %v3547_v47 = vld [vmem:[#allocation2 + $0x438] ss:$20 sps:$4 sm:$0xff]  }
  0x86   :  { %2009 = vmatpush1.bf16.msra.mxu0 %v3459_v49  ;;  %3179 = vmatpush3.bf16.msra.mxu1 %v3580_v3  ;;  %v3549_v49 = vld [vmem:[#allocation2 + $0x464] ss:$20 sps:$4 sm:$0xff]   ;;  %v3576_v3 = vld [vmem:[#allocation2 + $0x1ec] ss:$20 sps:$4 sm:$0xff]  }
  0x87   :  { %2010 = vmatprep.subr.bf16.mxu0 %v3962_v0  ;;  %3180 = vmatprep.subr.bf16.mxu1 %v3605_v24 }
  0x88   :  { %1706 = vmatmul.mubr.bf16.gmra.mrb[16].mxu0 %v3457_v48  ;;  %1786 = vmatmul.mubr.bf16.gmra.mrb[16].mxu1 %v3458_v50  ;;  %v3548_v48 = vld [vmem:[#allocation2 + $0x120] ss:$20 sps:$4 sm:$0xff]  }
  0x89   :  { %1713 = vmatprep.mubr.bf16.mxu0 %v3460_v51  ;;  %1793 = vmatprep.mubr.bf16.mxu1 %v3462_v52  ;;  %v3551_v50 = vld [vmem:[#allocation2 + $0x14c] ss:$20 sps:$4 sm:$0xff]   ;;  %v3554_v52 = vld [vmem:[#allocation2 + $0x148] ss:$20 sps:$4 sm:$0xff]  }
  0x8a   :  { %2011 = vmatpush1.bf16.msra.mxu0 %v3466_v53  ;;  %3181 = vmatpush3.bf16.msra.mxu1 %v3605_v24  ;;  %v3553_v51 = vld [vmem:[#allocation2 + $0x460] ss:$20 sps:$4 sm:$0xff]  }
  0x8b   :  { %2012 = vmatprep.subr.bf16.mxu0 %v3962_v0  ;;  %v3555_v53 = vld [vmem:[#allocation2 + $0x48c] ss:$20 sps:$4 sm:$0xff]  }
  0x8e   :  { %2013 = vmatpush1.bf16.msra.mxu0 %v3467_v54  ;;  %v3557_v54 = vld [vmem:[#allocation2 + $0x174] ss:$20 sps:$4 sm:$0xff]  }
  0x8f   :  { %2014 = vmatprep.subr.bf16.mxu0 %v3962_v0 }
  0x90   :  { %1714 = vmatmul.mubr.bf16.gmra.mrb[20].mxu0 %v3464_v55  ;;  %1794 = vmatmul.mubr.bf16.gmra.mrb[20].mxu1 %v3465_v56  ;;  %v3560_v55 = vld [vmem:[#allocation2 + $0x488] ss:$20 sps:$4 sm:$0xff]   ;;  %v3561_v56 = vld [vmem:[#allocation2 + $0x170] ss:$20 sps:$4 sm:$0xff]  }
  0x91   :  { %1721 = vmatprep.mubr.bf16.mxu0 %v3468_v57  ;;  %1801 = vmatprep.mubr.bf16.mxu1 %v3470_v58  ;;  %v3562_v57 = vld [vmem:[#allocation2 + $0x4b4] ss:$20 sps:$4 sm:$0xff]   ;;  %v3564_v58 = vld [vmem:[#allocation2 + $0x19c] ss:$20 sps:$4 sm:$0xff]  }
  0x92   :  { %2015 = vmatpush1.bf16.msra.mxu0 %v3474_v59  ;;  %v3566_v59 = vld [vmem:[#allocation2 + $0x4b0] ss:$20 sps:$4 sm:$0xff]  }
  0x93   :  { %2016 = vmatprep.subr.bf16.mxu0 %v3962_v0 }
  0x96   :  { %2017 = vmatpush1.bf16.msra.mxu0 %v3481_v60  ;;  %v3567_v60 = vld [vmem:[#allocation2 + $0x198] ss:$20 sps:$4 sm:$0xff]  }
  0x97   :  { %2018 = vmatprep.subr.bf16.mxu0 %v3962_v0 }
  0x98   :  { %1722 = vmatmul.mubr.bf16.gmra.mrb[24].mxu0 %v3472_v61  ;;  %1802 = vmatmul.mubr.bf16.gmra.mrb[24].mxu1 %v3473_v62  ;;  %v3568_v61 = vld [vmem:[#allocation2 + $0x4dc] ss:$20 sps:$4 sm:$0xff]   ;;  %v3570_v62 = vld [vmem:[#allocation2 + $0x1c4] ss:$20 sps:$4 sm:$0xff]  }
  0x99   :  { %1729 = vmatprep.mubr.bf16.mxu0 %v3475_v63  ;;  %1809 = vmatprep.mubr.bf16.mxu1 %v3477_v1  ;;  %v3572_v63 = vld [vmem:[#allocation2 + $0x4d8] ss:$20 sps:$4 sm:$0xff]   ;;  %v3573_v1 = vld [vmem:[#allocation2 + $0x1c0] ss:$20 sps:$4 sm:$0xff]  }
  0x9a   :  { %2019 = vmatpush1.bf16.msra.mxu0 %v3482_v2  ;;  %v3574_v2 = vld [vmem:[#allocation2 + $0x504] ss:$20 sps:$4 sm:$0xff]  }
  0x9b   :  { %2020 = vmatprep.subr.bf16.mxu0 %v3962_v0 }
  0x9e   :  { %2021 = vmatpush1.bf16.msra.mxu0 %v3490_v4  ;;  %v3578_v4 = vld [vmem:[#allocation2 + $0x500] ss:$20 sps:$4 sm:$0xff]  }
  0x9f   :  { %2022 = vmatprep.subr.bf16.mxu0 %v3962_v0 }
  0xa0   :  { %1730 = vmatmul.mubr.bf16.gmra.mrb[28].mxu0 %v3479_v5  ;;  %1810 = vmatmul.mubr.bf16.gmra.mrb[28].mxu1 %v3480_v6  ;;  %v3579_v5 = vld [vmem:[#allocation2 + $0x1e8] ss:$20 sps:$4 sm:$0xff]   ;;  %v3581_v6 = vld [vmem:[#allocation2 + $0x52c] ss:$20 sps:$4 sm:$0xff]  }
  0xa1   :  { %1737 = vmatprep.mubr.bf16.mxu0 %v3484_v7  ;;  %1817 = vmatprep.mubr.bf16.mxu1 %v3486_v8  ;;  %v3583_v7 = vld [vmem:[#allocation2 + $0x214] ss:$20 sps:$4 sm:$0xff]  }
  0xa2   :  { %2023 = vmatpush1.bf16.msra.mxu0 %v3495_v9  ;;  %v3585_v8 = vld [vmem:[#allocation2 + $0x528] ss:$20 sps:$4 sm:$0xff]   ;;  %v3586_v9 = vld [vmem:[#allocation2 + $0x210] ss:$20 sps:$4 sm:$0xff]  }
  0xa3   :  { %2024 = vmatprep.subr.bf16.mxu0 %v3962_v0  ;;  %v3509_v0 = vld [vmem:[#allocation2 + $0x348] ss:$20 sps:$4 sm:$0xff]  }
  0xa6   :  { %2025 = vmatpush1.bf16.msra.mxu0 %v3498_v10  ;;  %v3587_v10 = vld [vmem:[#allocation2 + $0x554] ss:$20 sps:$4 sm:$0xff]  }
  0xa8   :  { %1738 = vmatmul.mubr.bf16.gmra.mrb[32].mxu0 %v3488_v11  ;;  %1818 = vmatmul.mubr.bf16.gmra.mrb[32].mxu1 %v3489_v12  ;;  %v3589_v11 = vld [vmem:[#allocation2 + $0x23c] ss:$20 sps:$4 sm:$0xff]  }
  0xa9   :  { %1745 = vmatprep.mubr.bf16.mxu0 %v3491_v13  ;;  %1825 = vmatprep.mubr.bf16.mxu1 %v3493_v14  ;;  %v3591_v12 = vld [vmem:[#allocation2 + $0x550] ss:$20 sps:$4 sm:$0xff]   ;;  %v3592_v13 = vld [vmem:[#allocation2 + $0x238] ss:$20 sps:$4 sm:$0xff]  }
  0xaa   :  { %v3593_v14 = vld [vmem:[#allocation2 + $0x57c] ss:$20 sps:$4 sm:$0xff]  }
  0xb0   :  { %1746 = vmatmul.mubr.bf16.gmra.mrb[36].mxu0 %v3496_v15  ;;  %1826 = vmatmul.mubr.bf16.gmra.mrb[36].mxu1 %v3497_v16  ;;  %v3595_v15 = vld [vmem:[#allocation2 + $0x264] ss:$20 sps:$4 sm:$0xff]  }
  0xb1   :  { %1833 = vmatprep.mubr.bf16.mxu1 %v3499_v17  ;;  %2026 = vmatprep.mubr.bf16.mxu0 %v3503_v18  ;;  %v3597_v16 = vld [vmem:[#allocation2 + $0x578] ss:$20 sps:$4 sm:$0xff]   ;;  %v3598_v17 = vld [vmem:[#allocation2 + $0x260] ss:$20 sps:$4 sm:$0xff]  }
  0xb2   :  { %v3599_v18 = vld [vmem:[#allocation2 + $0x5a4] ss:$20 sps:$4 sm:$0xff]  }
  0xb8   :  { %1834 = vmatmul.mubr.bf16.gmra.mrb[40].mxu1 %v3504_v20  ;;  %2027 = vmatmul.mubr.bf16.vlgmr.msra.gmra.mrb[0].mxu0 %v3501_v19  ;;  %v3601_v19 = vld [vmem:[#allocation2 + $0x28c] ss:$20 sps:$4 sm:$0xff]  }
  0xb9   :  { %1841 = vmatprep.mubr.bf16.mxu1 %v3505_v21  ;;  %2034 = vmatprep.mubr.bf16.mxu0 %v3507_v22  ;;  %v3603_v20 = vld [vmem:[#allocation2 + $0x5a0] ss:$20 sps:$4 sm:$0xff]   ;;  %v3604_v21 = vld [vmem:[#allocation2 + $0x288] ss:$20 sps:$4 sm:$0xff]  }
  0xba   :  { %v3606_v22 = vld [vmem:[#allocation2 + $0x5cc] ss:$20 sps:$4 sm:$0xff]  }
  0xc0   :  { %1842 = vmatmul.mubr.bf16.gmra.mrb[44].mxu1 %v3509_v0  ;;  %2035 = vmatmul.mubr.bf16.gmra.mrb[4].mxu0 %v3510_v23  ;;  %v3608_v0 = vld [vmem:[#allocation2 + $0x2b4] ss:$20 sps:$4 sm:$0xff]  }
  0xc1   :  { %1849 = vmatprep.mubr.bf16.mxu1 %v3512_v25  ;;  %2042 = vmatprep.mubr.bf16.mxu0 %v3514_v26  ;;  %v3610_v25 = vld [vmem:[#allocation2 + $0x5c8] ss:$20 sps:$4 sm:$0xff]   ;;  %v3611_v26 = vld [vmem:[#allocation2 + $0x2b0] ss:$20 sps:$4 sm:$0xff]  }
  0xc8   :  { %1850 = vmatmul.mubr.bf16.gmra.mrb[48].mxu1 %v3516_v27  ;;  %2043 = vmatmul.mubr.bf16.gmra.mrb[8].mxu0 %v3517_v28  ;;  %v3612_v28 = vld [vmem:[#allocation2 + $0x5f4] ss:$20 sps:$4 sm:$0xff]  }
  0xc9   :  { %1857 = vmatprep.mubr.bf16.mxu1 %v3518_v29  ;;  %2050 = vmatprep.mubr.bf16.mxu0 %v3520_v30  ;;  %v3614_v29 = vld [vmem:[#allocation2 + $0x2dc] ss:$20 sps:$4 sm:$0xff]  }
  0xd0   :  { %1858 = vmatmul.mubr.bf16.gmra.mrb[52].mxu1 %v3522_v31  ;;  %2051 = vmatmul.mubr.bf16.gmra.mrb[12].mxu0 %v3523_v32 }
  0xd1   :  { %1865 = vmatprep.mubr.bf16.mxu1 %v3524_v33  ;;  %2058 = vmatprep.mubr.bf16.mxu0 %v3526_v34  ;;  %v3616_v33 = vld [vmem:[#allocation2 + $0x5f0] ss:$20 sps:$4 sm:$0xff]   ;;  %v3617_v34 = vld [vmem:[#allocation2 + $0x2d8] ss:$20 sps:$4 sm:$0xff]  }
  0xd8   :  { %1866 = vmatmul.mubr.bf16.gmra.mrb[56].mxu1 %v3528_v35  ;;  %2059 = vmatmul.mubr.bf16.gmra.mrb[16].mxu0 %v3529_v36  ;;  %v3618_v36 = vld [vmem:[#allocation2 + $0x61c] ss:$20 sps:$4 sm:$0xff]  }
  0xd9   :  { %1873 = vmatprep.mubr.bf16.mxu1 %v3530_v37  ;;  %2066 = vmatprep.mubr.bf16.mxu0 %v3532_v38  ;;  %v3620_v37 = vld [vmem:[#allocation2 + $0x304] ss:$20 sps:$4 sm:$0xff]  }
  0xe0   :  { %1874 = vmatmul.mubr.bf16.gmra.mrb[60].mxu1 %v3534_v39  ;;  %2067 = vmatmul.mubr.bf16.gmra.mrb[20].mxu0 %v3535_v40 }
  0xe1   :  { %1881 = vmatprep.mubr.bf16.mxu1 %v3537_v41  ;;  %2074 = vmatprep.mubr.bf16.mxu0 %v3539_v42  ;;  %v3622_v41 = vld [vmem:[#allocation2 + $0x618] ss:$20 sps:$4 sm:$0xff]   ;;  %v3623_v42 = vld [vmem:[#allocation2 + $0x300] ss:$20 sps:$4 sm:$0xff]  }
  0xe8   :  { %1882 = vmatmul.mubr.bf16.gmra.mrb[64].mxu1 %v3541_v43  ;;  %2075 = vmatmul.mubr.bf16.gmra.mrb[24].mxu0 %v3542_v44  ;;  %v3624_v44 = vld [vmem:[#allocation2 + $0x32c] ss:$20 sps:$4 sm:$0xff]  }
  0xe9   :  { %1889 = vmatprep.mubr.bf16.mxu1 %v3543_v45  ;;  %2082 = vmatprep.mubr.bf16.mxu0 %v3545_v46  ;;  %v3626_v45 = vld [vmem:[#allocation2 + $0x10] ss:$20 sps:$4 sm:$0xff]  }
  0xf0   :  { %1890 = vmatmul.mubr.bf16.gmra.mrb[68].mxu1 %v3547_v47  ;;  %2083 = vmatmul.mubr.bf16.gmra.mrb[28].mxu0 %v3548_v48 }
  0xf1   :  { %1897 = vmatprep.mubr.bf16.mxu1 %v3549_v49  ;;  %2090 = vmatprep.mubr.bf16.mxu0 %v3551_v50  ;;  %v3627_v49 = vld [vmem:[#allocation2 + $0x328] ss:$20 sps:$4 sm:$0xff]   ;;  %v3628_v50 = vld [vmem:[#allocation2 + $0x38] ss:$20 sps:$4 sm:$0xff]  }
  0xf8   :  { %1898 = vmatmul.mubr.bf16.gmra.mrb[72].mxu1 %v3553_v51  ;;  %2091 = vmatmul.mubr.bf16.gmra.mrb[32].mxu0 %v3554_v52  ;;  %v3629_v52 = vld [vmem:[#allocation2 + $0x354] ss:$20 sps:$4 sm:$0xff]  }
  0xf9   :  { %1905 = vmatprep.mubr.bf16.mxu1 %v3555_v53  ;;  %2098 = vmatprep.mubr.bf16.mxu0 %v3557_v54  ;;  %v3631_v53 = vld [vmem:[#allocation2 + $0x60] ss:$20 sps:$4 sm:$0xff]  }
 0x100   :  { %1906 = vmatmul.mubr.bf16.gmra.mrb[76].mxu1 %v3560_v55  ;;  %2099 = vmatmul.mubr.bf16.gmra.mrb[36].mxu0 %v3561_v56 }
 0x101   :  { %1913 = vmatprep.mubr.bf16.mxu1 %v3562_v57  ;;  %2106 = vmatprep.mubr.bf16.mxu0 %v3564_v58  ;;  %v3632_v57 = vld [vmem:[#allocation2 + $0x350] ss:$20 sps:$4 sm:$0xff]   ;;  %v3633_v58 = vld [vmem:[#allocation2 + $0x88] ss:$20 sps:$4 sm:$0xff]  }
 0x108   :  { %1914 = vmatmul.mubr.bf16.gmra.mrb[80].mxu1 %v3566_v59  ;;  %2107 = vmatmul.mubr.bf16.gmra.mrb[40].mxu0 %v3567_v60  ;;  %v3634_v60 = vld [vmem:[#allocation2 + $0x37c] ss:$20 sps:$4 sm:$0xff]  }
 0x109   :  { %1921 = vmatprep.mubr.bf16.mxu1 %v3568_v61  ;;  %2114 = vmatprep.mubr.bf16.mxu0 %v3570_v62  ;;  %v3636_v61 = vld [vmem:[#allocation2 + $0xb0] ss:$20 sps:$4 sm:$0xff]  }
 0x110   :  { %1922 = vmatmul.mubr.bf16.gmra.mrb[84].mxu1 %v3572_v63  ;;  %2115 = vmatmul.mubr.bf16.gmra.mrb[44].mxu0 %v3573_v1 }
 0x111   :  { %1929 = vmatprep.mubr.bf16.mxu1 %v3574_v2  ;;  %2122 = vmatprep.mubr.bf16.mxu0 %v3576_v3  ;;  %v3637_v2 = vld [vmem:[#allocation2 + $0x378] ss:$20 sps:$4 sm:$0xff]  }
 0x112   :  { %v3638_v3 = vld [vmem:[#allocation2 + $0xd8] ss:$20 sps:$4 sm:$0xff]  }
 0x118   :  { %1930 = vmatmul.mubr.bf16.gmra.mrb[88].mxu1 %v3578_v4  ;;  %2123 = vmatmul.mubr.bf16.gmra.mrb[48].mxu0 %v3579_v5  ;;  %v3639_v5 = vld [vmem:[#allocation2 + $0x3a4] ss:$20 sps:$4 sm:$0xff]  }
 0x119   :  { %1937 = vmatprep.mubr.bf16.mxu1 %v3581_v6  ;;  %2130 = vmatprep.mubr.bf16.mxu0 %v3583_v7  ;;  %v3641_v6 = vld [vmem:[#allocation2 + $0x100] ss:$20 sps:$4 sm:$0xff]  }
 0x120   :  { %1938 = vmatmul.mubr.bf16.gmra.mrb[92].mxu1 %v3585_v8  ;;  %2131 = vmatmul.mubr.bf16.gmra.mrb[52].mxu0 %v3586_v9 }
 0x121   :  { %1945 = vmatprep.mubr.bf16.mxu1 %v3587_v10  ;;  %2138 = vmatprep.mubr.bf16.mxu0 %v3589_v11  ;;  %v3642_v10 = vld [vmem:[#allocation2 + $0x3a0] ss:$20 sps:$4 sm:$0xff]   ;;  %v3643_v11 = vld [vmem:[#allocation2 + $0x128] ss:$20 sps:$4 sm:$0xff]  }
 0x128   :  { %1946 = vmatmul.mubr.bf16.gmra.mrb[96].mxu1 %v3591_v12  ;;  %2139 = vmatmul.mubr.bf16.gmra.mrb[56].mxu0 %v3592_v13  ;;  %v3644_v13 = vld [vmem:[#allocation2 + $0x3cc] ss:$20 sps:$4 sm:$0xff]  }
 0x129   :  { %1953 = vmatprep.mubr.bf16.mxu1 %v3593_v14  ;;  %2146 = vmatprep.mubr.bf16.mxu0 %v3595_v15  ;;  %v3646_v14 = vld [vmem:[#allocation2 + $0x150] ss:$20 sps:$4 sm:$0xff]  }
 0x130   :  { %1954 = vmatmul.mubr.bf16.gmra.mrb[100].mxu1 %v3597_v16  ;;  %2147 = vmatmul.mubr.bf16.gmra.mrb[60].mxu0 %v3598_v17 }
 0x131   :  { %1961 = vmatprep.mubr.bf16.mxu1 %v3599_v18  ;;  %2154 = vmatprep.mubr.bf16.mxu0 %v3601_v19  ;;  %v3647_v18 = vld [vmem:[#allocation2 + $0x3c8] ss:$20 sps:$4 sm:$0xff]   ;;  %v3648_v19 = vld [vmem:[#allocation2 + $0x178] ss:$20 sps:$4 sm:$0xff]  }
 0x138   :  { %1962 = vmatmul.mubr.bf16.gmra.mrb[104].mxu1 %v3603_v20  ;;  %2155 = vmatmul.mubr.bf16.gmra.mrb[64].mxu0 %v3604_v21  ;;  %v3649_v21 = vld [vmem:[#allocation2 + $0x3f4] ss:$20 sps:$4 sm:$0xff]  }
 0x139   :  { %1969 = vmatprep.mubr.bf16.mxu1 %v3606_v22  ;;  %2162 = vmatprep.mubr.bf16.mxu0 %v3608_v0  ;;  %v3651_v22 = vld [vmem:[#allocation2 + $0x1a0] ss:$20 sps:$4 sm:$0xff]  }
 0x13b   :  { %v4053_v23 = vpop.f32.mrb[0].mxu1 }
 0x13c   :  { %v1757_v24 = vpop.f32.mrb[1].mxu1 }
 0x13d   :  { %v4055_v27 = vpop.f32.mrb[2].mxu1 }
 0x13e   :  { %v1760_v30 = vpop.f32.mrb[3].mxu1 }
 0x13f   :  { %v3654_v30 = vld [vmem:[#allocation2 + $0x41c] ss:$20 sps:$4 sm:$0xff]  }
 0x140   :  { %1970 = vmatmul.mubr.bf16.gmra.mrb[108].mxu1 %v3610_v25  ;;  %2163 = vmatmul.mubr.bf16.gmra.mrb[68].mxu0 %v3611_v26  ;;  %v3652_v26 = vld [vmem:[#allocation2 + $0x3f0] ss:$20 sps:$4 sm:$0xff]  }
 0x141   :  { %1977 = vmatprep.mubr.bf16.mxu1 %v3612_v28  ;;  %2170 = vmatprep.mubr.bf16.mxu0 %v3614_v29  ;;  %v3653_v28 = vld [vmem:[#allocation2 + $0x1c8] ss:$20 sps:$4 sm:$0xff]  }
 0x143   :  { %v4057_v31 = vpop.f32.mrb[4].mxu1 }
 0x144   :  { %v1765_v32 = vpop.f32.mrb[5].mxu1 }
 0x145   :  { %v4059_v35 = vpop.f32.mrb[6].mxu1  ;;  %v3656_v32 = vld [vmem:[#allocation2 + $0x1f0] ss:$20 sps:$4 sm:$0xff]  }
 0x146   :  { %v1768_v38 = vpop.f32.mrb[7].mxu1 }
 0x147   :  { %v3658_v38 = vld [vmem:[#allocation2 + $0x218] ss:$20 sps:$4 sm:$0xff]  }
 0x148   :  { %1978 = vmatmul.mubr.bf16.gmra.mrb[112].mxu1 %v3616_v33  ;;  %2171 = vmatmul.mubr.bf16.gmra.mrb[72].mxu0 %v3617_v34 }
 0x149   :  { %1985 = vmatprep.mubr.bf16.mxu1 %v3618_v36  ;;  %2178 = vmatprep.mubr.bf16.mxu0 %v3620_v37  ;;  %v3657_v37 = vld [vmem:[#allocation2 + $0x418] ss:$20 sps:$4 sm:$0xff]  }
 0x14b   :  { %v4061_v39 = vpop.f32.mrb[8].mxu1 }
 0x14c   :  { %v1773_v40 = vpop.f32.mrb[9].mxu1 }
 0x14d   :  { %v4063_v43 = vpop.f32.mrb[10].mxu1 }
 0x14e   :  { %v1776_v46 = vpop.f32.mrb[11].mxu1 }
 0x150   :  { %1986 = vmatmul.mubr.bf16.gmra.mrb[116].mxu1 %v3622_v41  ;;  %2179 = vmatmul.mubr.bf16.gmra.mrb[76].mxu0 %v3623_v42  ;;  %v3659_v41 = vld [vmem:[#allocation2 + $0x444] ss:$20 sps:$4 sm:$0xff]   ;;  %v3661_v42 = vld [vmem:[#allocation2 + $0x240] ss:$20 sps:$4 sm:$0xff]  }
 0x151   :  { %2186 = vmatprep.mubr.bf16.mxu0 %v3624_v44  ;;  %3182 = vmatprep.mubr.bf16.mxu1 %v3626_v45 }
 0x153   :  { %v4065_v47 = vpop.f32.mrb[12].mxu1 }
 0x154   :  { %v1781_v48 = vpop.f32.mrb[13].mxu1 }
 0x155   :  { %v4067_v51 = vpop.f32.mrb[14].mxu1 }
 0x156   :  { %v1784_v54 = vpop.f32.mrb[15].mxu1 }
 0x158   :  { %2187 = vmatmul.mubr.bf16.gmra.mrb[80].mxu0 %v3627_v49  ;;  %3183 = vmatmul.mubr.bf16.vlgmr.msra.gmra.mrb[120].mxu1 %v3628_v50  ;;  %v3662_v50 = vld [vmem:[#allocation2 + $0x440] ss:$20 sps:$4 sm:$0xff]  }
 0x159   :  { %2194 = vmatprep.mubr.bf16.mxu0 %v3629_v52  ;;  %3186 = vmatprep.mubr.bf16.mxu1 %v3631_v53  ;;  %v3663_v52 = vld [vmem:[#allocation2 + $0x268] ss:$20 sps:$4 sm:$0xff]  }
 0x15b   :  { %v4069_v55 = vpop.f32.mrb[16].mxu1 }
 0x15c   :  { %v1789_v56 = vpop.f32.mrb[17].mxu1 }
 0x15d   :  { %v4071_v59 = vpop.f32.mrb[18].mxu1  ;;  %v3664_v56 = vld [vmem:[#allocation2 + $0x46c] ss:$20 sps:$4 sm:$0xff]  }
 0x15e   :  { %v1792_v62 = vpop.f32.mrb[19].mxu1 }
 0x160   :  { %2195 = vmatmul.mubr.bf16.gmra.mrb[84].mxu0 %v3632_v57  ;;  %3187 = vmatmul.mubr.bf16.gmra.mrb[124].mxu1 %v3633_v58  ;;  %v3666_v57 = vld [vmem:[#allocation2 + $0x290] ss:$20 sps:$4 sm:$0xff]  }
 0x161   :  { %2202 = vmatprep.mubr.bf16.mxu0 %v3634_v60  ;;  %3190 = vmatprep.mubr.bf16.mxu1 %v3636_v61 }
 0x163   :  { %v4073_v63 = vpop.f32.mrb[20].mxu1 }
 0x164   :  { %v1797_v1 = vpop.f32.mrb[21].mxu1 }
 0x165   :  { %v4075_v4 = vpop.f32.mrb[22].mxu1 }
 0x166   :  { %v1800_v7 = vpop.f32.mrb[23].mxu1 }
 0x168   :  { %2203 = vmatmul.mubr.bf16.gmra.mrb[88].mxu0 %v3637_v2  ;;  %3191 = vmatmul.mubr.bf16.gmra.mrb[128].mxu1 %v3638_v3  ;;  %v3667_v3 = vld [vmem:[#allocation2 + $0x468] ss:$20 sps:$4 sm:$0xff]  }
 0x169   :  { %2210 = vmatprep.mubr.bf16.mxu0 %v3639_v5  ;;  %3194 = vmatprep.mubr.bf16.mxu1 %v3641_v6  ;;  %v3668_v5 = vld [vmem:[#allocation2 + $0x2b8] ss:$20 sps:$4 sm:$0xff]  }
 0x16b   :  { %v4077_v8 = vpop.f32.mrb[24].mxu1 }
 0x16c   :  { %v1805_v9 = vpop.f32.mrb[25].mxu1 }
 0x16d   :  { %v4079_v12 = vpop.f32.mrb[26].mxu1  ;;  %v3669_v9 = vld [vmem:[#allocation2 + $0x494] ss:$20 sps:$4 sm:$0xff]  }
 0x16e   :  { %v1808_v15 = vpop.f32.mrb[27].mxu1 }
 0x170   :  { %2211 = vmatmul.mubr.bf16.gmra.mrb[92].mxu0 %v3642_v10  ;;  %3195 = vmatmul.mubr.bf16.gmra.mrb[132].mxu1 %v3643_v11  ;;  %v3671_v10 = vld [vmem:[#allocation2 + $0x2e0] ss:$20 sps:$4 sm:$0xff]  }
 0x171   :  { %2218 = vmatprep.mubr.bf16.mxu0 %v3644_v13  ;;  %3198 = vmatprep.mubr.bf16.mxu1 %v3646_v14 }
 0x173   :  { %v4081_v16 = vpop.f32.mrb[28].mxu1 }
 0x174   :  { %v1813_v17 = vpop.f32.mrb[29].mxu1 }
 0x175   :  { %v4083_v20 = vpop.f32.mrb[30].mxu1 }
 0x176   :  { %v1816_v0 = vpop.f32.mrb[31].mxu1 }
 0x178   :  { %2219 = vmatmul.mubr.bf16.gmra.mrb[96].mxu0 %v3647_v18  ;;  %3199 = vmatmul.mubr.bf16.gmra.mrb[136].mxu1 %v3648_v19  ;;  %v3672_v19 = vld [vmem:[#allocation2 + $0x490] ss:$20 sps:$4 sm:$0xff]  }
 0x179   :  { %2226 = vmatprep.mubr.bf16.mxu0 %v3649_v21  ;;  %3202 = vmatprep.mubr.bf16.mxu1 %v3651_v22  ;;  %v3673_v21 = vld [vmem:[#allocation2 + $0x308] ss:$20 sps:$4 sm:$0xff]  }
 0x17b   :  { %v4085_v24 = vpop.f32.mrb[32].mxu1 }
 0x17c   :  { %v1821_v25 = vpop.f32.mrb[33].mxu1 }
 0x17d   :  { %v4087_v29 = vpop.f32.mrb[34].mxu1  ;;  %v3674_v25 = vld [vmem:[#allocation2 + $0x4bc] ss:$20 sps:$4 sm:$0xff]  }
 0x17e   :  { %v1824_v33 = vpop.f32.mrb[35].mxu1 }
 0x180   :  { %2227 = vmatmul.mubr.bf16.gmra.mrb[100].mxu0 %v3652_v26  ;;  %3203 = vmatmul.mubr.bf16.gmra.mrb[140].mxu1 %v3653_v28  ;;  %v3676_v26 = vld [vmem:[#allocation2 + $0x330] ss:$20 sps:$4 sm:$0xff]  }
 0x181   :  { %2234 = vmatprep.mubr.bf16.mxu0 %v3654_v30  ;;  %3206 = vmatprep.mubr.bf16.mxu1 %v3656_v32 }
 0x183   :  { %v4089_v34 = vpop.f32.mrb[36].mxu1 }
 0x184   :  { %v1829_v36 = vpop.f32.mrb[37].mxu1 }
 0x185   :  { %v4091_v40 = vpop.f32.mrb[38].mxu1 }
 0x186   :  { %v1832_v44 = vpop.f32.mrb[39].mxu1 }
 0x188   :  { %2235 = vmatmul.mubr.bf16.gmra.mrb[104].mxu0 %v3657_v37  ;;  %3207 = vmatmul.mubr.bf16.gmra.mrb[144].mxu1 %v3658_v38  ;;  %v3677_v38 = vld [vmem:[#allocation2 + $0x4b8] ss:$20 sps:$4 sm:$0xff]  }
 0x189   :  { %2242 = vmatprep.mubr.bf16.mxu0 %v3659_v41  ;;  %3210 = vmatprep.mubr.bf16.mxu1 %v3661_v42  ;;  %v3678_v41 = vld [vmem:[#allocation2 + $0x358] ss:$20 sps:$4 sm:$0xff]  }
 0x18b   :  { %v4093_v45 = vpop.f32.mrb[40].mxu1  ;;  %v4095_v46 = vpop.f32.mrb[0].mxu0 }
 0x18c   :  { %v1837_v48 = vpop.f32.mrb[41].mxu1  ;;  %v2030_v49 = vpop.f32.mrb[1].mxu0 }
 0x18d   :  { %v4097_v53 = vpop.f32.mrb[42].mxu1  ;;  %v4099_v54 = vpop.f32.mrb[2].mxu0  ;;  %v3679_v48 = vld [vmem:[#allocation2 + $0x4e4] ss:$20 sps:$4 sm:$0xff]   ;;  %v3681_v49 = vld [vmem:[#allocation2 + $0x380] ss:$20 sps:$4 sm:$0xff]  }
 0x18e   :  { %v1840_v58 = vpop.f32.mrb[43].mxu1  ;;  %v2033_v60 = vpop.f32.mrb[3].mxu0 }
 0x190   :  { %2243 = vmatmul.mubr.bf16.gmra.mrb[108].mxu0 %v3662_v50  ;;  %3211 = vmatmul.mubr.bf16.gmra.mrb[148].mxu1 %v3663_v52 }
 0x191   :  { %2250 = vmatprep.mubr.bf16.mxu0 %v3664_v56  ;;  %3214 = vmatprep.mubr.bf16.mxu1 %v3666_v57 }
 0x193   :  { %v4101_v61 = vpop.f32.mrb[44].mxu1  ;;  %v4103_v62 = vpop.f32.mrb[4].mxu0 }
 0x194   :  { %v1845_v1 = vpop.f32.mrb[45].mxu1  ;;  %v2038_v2 = vpop.f32.mrb[5].mxu0 }
 0x195   :  { %v4105_v6 = vpop.f32.mrb[46].mxu1  ;;  %v4107_v7 = vpop.f32.mrb[6].mxu0  ;;  %v3682_v1 = vld [vmem:[#allocation2 + $0x4e0] ss:$20 sps:$4 sm:$0xff]   ;;  %v3683_v2 = vld [vmem:[#allocation2 + $0x3a8] ss:$20 sps:$4 sm:$0xff]  }
 0x196   :  { %v1848_v11 = vpop.f32.mrb[47].mxu1  ;;  %v2041_v13 = vpop.f32.mrb[7].mxu0 }
 0x198   :  { %2251 = vmatmul.mubr.bf16.gmra.mrb[112].mxu0 %v3667_v3  ;;  %3215 = vmatmul.mubr.bf16.gmra.mrb[152].mxu1 %v3668_v5 }
 0x199   :  { %2258 = vmatprep.mubr.bf16.mxu0 %v3669_v9  ;;  %3218 = vmatprep.mubr.bf16.mxu1 %v3671_v10  ;;  %v3684_v9 = vld [vmem:[#allocation2 + $0x50c] ss:$20 sps:$4 sm:$0xff]   ;;  %v3686_v10 = vld [vmem:[#allocation2 + $0x3d0] ss:$20 sps:$4 sm:$0xff]  }
 0x19b   :  { %v4109_v14 = vpop.f32.mrb[48].mxu1  ;;  %v4111_v15 = vpop.f32.mrb[8].mxu0 }
 0x19c   :  { %v1853_v17 = vpop.f32.mrb[49].mxu1  ;;  %v2046_v18 = vpop.f32.mrb[9].mxu0 }
 0x19d   :  { %v4113_v22 = vpop.f32.mrb[50].mxu1  ;;  %v4115_v0 = vpop.f32.mrb[10].mxu0 }
 0x19e   :  { %v1856_v28 = vpop.f32.mrb[51].mxu1  ;;  %v2049_v30 = vpop.f32.mrb[11].mxu0 }
 0x1a0   :  { %2259 = vmatmul.mubr.bf16.gmra.mrb[116].mxu0 %v3672_v19  ;;  %3219 = vmatmul.mubr.bf16.gmra.mrb[156].mxu1 %v3673_v21 }
 0x1a1   :  { %2266 = vmatprep.mubr.bf16.mxu0 %v3674_v25  ;;  %3222 = vmatprep.mubr.bf16.mxu1 %v3676_v26  ;;  %v3687_v25 = vld [vmem:[#allocation2 + $0x508] ss:$20 sps:$4 sm:$0xff]   ;;  %v3688_v26 = vld [vmem:[#allocation2 + $0x3f8] ss:$20 sps:$4 sm:$0xff]  }
 0x1a3   :  { %v4117_v32 = vpop.f32.mrb[52].mxu1  ;;  %v4119_v33 = vpop.f32.mrb[12].mxu0 }
 0x1a4   :  { %v1861_v36 = vpop.f32.mrb[53].mxu1  ;;  %v2054_v37 = vpop.f32.mrb[13].mxu0 }
 0x1a5   :  { %v4121_v42 = vpop.f32.mrb[54].mxu1  ;;  %v4123_v44 = vpop.f32.mrb[14].mxu0  ;;  %v3689_v36 = vld [vmem:[#allocation2 + $0x534] ss:$20 sps:$4 sm:$0xff]  }
 0x1a6   :  { %v1864_v50 = vpop.f32.mrb[55].mxu1  ;;  %v2057_v52 = vpop.f32.mrb[15].mxu0  ;;  %v3691_v37 = vld [vmem:[#allocation2 + $0x420] ss:$20 sps:$4 sm:$0xff]  }
 0x1a8   :  { %2267 = vmatmul.mubr.bf16.gmra.mrb[120].mxu0 %v3677_v38  ;;  %3223 = vmatmul.mubr.bf16.gmra.mrb[160].mxu1 %v3678_v41 }
 0x1a9   :  { %2274 = vmatprep.mubr.bf16.mxu0 %v3679_v48  ;;  %3226 = vmatprep.mubr.bf16.mxu1 %v3681_v49 }
 0x1ab   :  { %v4125_v56 = vpop.f32.mrb[56].mxu1  ;;  %v4127_v57 = vpop.f32.mrb[16].mxu0 }
 0x1ac   :  { %v1869_v58 = vpop.f32.mrb[57].mxu1  ;;  %v2062_v60 = vpop.f32.mrb[17].mxu0 }
 0x1ad   :  { %v4129_v3 = vpop.f32.mrb[58].mxu1  ;;  %v4131_v5 = vpop.f32.mrb[18].mxu0  ;;  %v3692_v58 = vld [vmem:[#allocation2 + $0x530] ss:$20 sps:$4 sm:$0xff]   ;;  %v3693_v60 = vld [vmem:[#allocation2 + $0x448] ss:$20 sps:$4 sm:$0xff]  }
 0x1ae   :  { %v1872_v11 = vpop.f32.mrb[59].mxu1  ;;  %v2065_v13 = vpop.f32.mrb[19].mxu0 }
 0x1b0   :  { %2275 = vmatmul.mubr.bf16.gmra.mrb[124].mxu0 %v3682_v1  ;;  %3227 = vmatmul.mubr.bf16.gmra.mrb[164].mxu1 %v3683_v2 }
 0x1b1   :  { %2282 = vmatprep.mubr.bf16.mxu0 %v3684_v9  ;;  %3230 = vmatprep.mubr.bf16.mxu1 %v3686_v10  ;;  %v3694_v9 = vld [vmem:[#allocation2 + $0x55c] ss:$20 sps:$4 sm:$0xff]  }
 0x1b2   :  { %v3696_v10 = vld [vmem:[#allocation2 + $0x470] ss:$20 sps:$4 sm:$0xff]  }
 0x1b3   :  { %v4133_v17 = vpop.f32.mrb[60].mxu1  ;;  %v4135_v18 = vpop.f32.mrb[20].mxu0 }
 0x1b4   :  { %4458 = vst [vmem:[#allocation11_spill] sm:$0xff] %v4133_v17  ;;  %v1877_v19 = vpop.f32.mrb[61].mxu1  ;;  %v2070_v21 = vpop.f32.mrb[21].mxu0  ;;  %v3711_v17 = vld [vmem:[#allocation2 + $0x560] ss:$20 sps:$4 sm:$0xff]  }
 0x1b5   :  { %v4137_v28 = vpop.f32.mrb[62].mxu1  ;;  %v4139_v30 = vpop.f32.mrb[22].mxu0 }
 0x1b6   :  { %4459 = vst [vmem:[#allocation12_spill] sm:$0xff] %v4137_v28  ;;  %v1880_v38 = vpop.f32.mrb[63].mxu1  ;;  %v2073_v41 = vpop.f32.mrb[23].mxu0  ;;  %v3709_v28 = vld [vmem:[#allocation2 + $0x5d4] ss:$20 sps:$4 sm:$0xff]  }
 0x1b8   :  { %2283 = vmatmul.mubr.bf16.gmra.mrb[128].mxu0 %v3687_v25  ;;  %3231 = vmatmul.mubr.bf16.gmra.mrb[168].mxu1 %v3688_v26 }
 0x1b9   :  { %2290 = vmatprep.mubr.bf16.mxu0 %v3689_v36  ;;  %3234 = vmatprep.mubr.bf16.mxu1 %v3691_v37  ;;  %v3697_v36 = vld [vmem:[#allocation2 + $0x558] ss:$20 sps:$4 sm:$0xff]  }
 0x1ba   :  { %v3698_v37 = vld [vmem:[#allocation2 + $0x498] ss:$20 sps:$4 sm:$0xff]  }
 0x1bb   :  { %v4141_v48 = vpop.f32.mrb[64].mxu1  ;;  %v4143_v49 = vpop.f32.mrb[24].mxu0 }
 0x1bc   :  { %4460 = vst [vmem:[#allocation13_spill] sm:$0xff] %v4141_v48  ;;  %v1885_v50 = vpop.f32.mrb[65].mxu1  ;;  %v2078_v52 = vpop.f32.mrb[25].mxu0  ;;  %v3706_v48 = vld [vmem:[#allocation2 + $0x510] ss:$20 sps:$4 sm:$0xff]  }
 0x1bd   :  { %v4145_v1 = vpop.f32.mrb[66].mxu1  ;;  %v4147_v2 = vpop.f32.mrb[26].mxu0  ;;  %v3699_v50 = vld [vmem:[#allocation2 + $0x584] ss:$20 sps:$4 sm:$0xff]   ;;  %v3701_v52 = vld [vmem:[#allocation2 + $0x4c0] ss:$20 sps:$4 sm:$0xff]  }
 0x1be   :  { %4461 = vst [vmem:[#allocation14_spill] sm:$0xff] %v4145_v1  ;;  %v1888_v11 = vpop.f32.mrb[67].mxu1  ;;  %v2081_v13 = vpop.f32.mrb[27].mxu0  ;;  %v3704_v1 = vld [vmem:[#allocation2 + $0x5ac] ss:$20 sps:$4 sm:$0xff]  }
 0x1c0   :  { %2291 = vmatmul.mubr.bf16.gmra.mrb[132].mxu0 %v3692_v58  ;;  %3235 = vmatmul.mubr.bf16.gmra.mrb[172].mxu1 %v3693_v60 }
 0x1c1   :  { %2298 = vmatprep.mubr.bf16.mxu0 %v3694_v9  ;;  %3238 = vmatprep.mubr.bf16.mxu1 %v3696_v10 }
 0x1c3   :  { %v4149_v19 = vpop.f32.mrb[68].mxu1  ;;  %v4151_v21 = vpop.f32.mrb[28].mxu0 }
 0x1c4   :  { %4462 = vst [vmem:[#allocation15_spill] sm:$0xff] %v4149_v19  ;;  %v1893_v25 = vpop.f32.mrb[69].mxu1  ;;  %v2086_v26 = vpop.f32.mrb[29].mxu0 }
 0x1c5   :  { %v4153_v38 = vpop.f32.mrb[70].mxu1  ;;  %v4155_v41 = vpop.f32.mrb[30].mxu0  ;;  %v3702_v25 = vld [vmem:[#allocation2 + $0x580] ss:$20 sps:$4 sm:$0xff]   ;;  %v3703_v26 = vld [vmem:[#allocation2 + $0x4e8] ss:$20 sps:$4 sm:$0xff]  }
 0x1c6   :  { %4463 = vst [vmem:[#allocation16_spill] sm:$0xff] %v4153_v38  ;;  %v1896_v11 = vpop.f32.mrb[71].mxu1  ;;  %v2089_v13 = vpop.f32.mrb[31].mxu0 }
 0x1c8   :  { %2299 = vmatmul.mubr.bf16.gmra.mrb[136].mxu0 %v3697_v36  ;;  %3239 = vmatmul.mubr.bf16.gmra.mrb[176].mxu1 %v3698_v37 }
 0x1c9   :  { %2306 = vmatprep.mubr.bf16.mxu0 %v3699_v50  ;;  %3242 = vmatprep.mubr.bf16.mxu1 %v3701_v52 }
 0x1cb   :  { %v4157_v58 = vpop.f32.mrb[72].mxu1  ;;  %v4159_v60 = vpop.f32.mrb[32].mxu0 }
 0x1cc   :  { %4464 = vst [vmem:[#allocation17_spill] sm:$0xff] %v4157_v58  ;;  %v1901_v9 = vpop.f32.mrb[73].mxu1  ;;  %v2094_v10 = vpop.f32.mrb[33].mxu0 }
 0x1cd   :  { %v4161_v19 = vpop.f32.mrb[74].mxu1  ;;  %v4163_v38 = vpop.f32.mrb[34].mxu0  ;;  %v3707_v9 = vld [vmem:[#allocation2 + $0x5a8] ss:$20 sps:$4 sm:$0xff]   ;;  %v3708_v10 = vld [vmem:[#allocation2 + $0x538] ss:$20 sps:$4 sm:$0xff]  }
 0x1ce   :  { %4465 = vst [vmem:[#allocation18_spill] sm:$0xff] %v4161_v19  ;;  %4466 = vst [vmem:[#allocation19_spill] sm:$0xff] %v4163_v38  ;;  %v1904_v11 = vpop.f32.mrb[75].mxu1  ;;  %v2097_v13 = vpop.f32.mrb[35].mxu0 }
 0x1d0   :  { %2307 = vmatmul.mubr.bf16.gmra.mrb[140].mxu0 %v3702_v25  ;;  %3243 = vmatmul.mubr.bf16.gmra.mrb[180].mxu1 %v3703_v26 }
 0x1d1   :  { %2314 = vmatprep.mubr.bf16.mxu0 %v3704_v1  ;;  %3246 = vmatprep.mubr.bf16.mxu1 %v3706_v48 }
 0x1d3   :  { %v4165_v36 = vpop.f32.mrb[76].mxu1  ;;  %v4167_v37 = vpop.f32.mrb[36].mxu0 }
 0x1d4   :  { %4467 = vst [vmem:[#allocation20_spill] sm:$0xff] %v4165_v36  ;;  %v1909_v50 = vpop.f32.mrb[77].mxu1  ;;  %v2102_v52 = vpop.f32.mrb[37].mxu0 }
 0x1d5   :  { %v4169_v58 = vpop.f32.mrb[78].mxu1  ;;  %v4171_v19 = vpop.f32.mrb[38].mxu0  ;;  %v3712_v52 = vld [vmem:[#allocation2 + $0x5d0] ss:$20 sps:$4 sm:$0xff]  }
 0x1d6   :  { %4468 = vst [vmem:[#allocation21_spill] sm:$0xff] %v4169_v58  ;;  %4469 = vst [vmem:[#allocation22_spill] sm:$0xff] %v4171_v19  ;;  %v1912_v11 = vpop.f32.mrb[79].mxu1  ;;  %v2105_v13 = vpop.f32.mrb[39].mxu0  ;;  %v3713_v58 = vld [vmem:[#allocation2 + $0x588] ss:$20 sps:$4 sm:$0xff]  }
 0x1d7   :  { %v3714_v19 = vld [vmem:[#allocation2 + $0x5fc] ss:$20 sps:$4 sm:$0xff]  }
 0x1d8   :  { %2315 = vmatmul.mubr.bf16.gmra.mrb[144].mxu0 %v3707_v9  ;;  %3247 = vmatmul.mubr.bf16.gmra.mrb[184].mxu1 %v3708_v10  ;;  %v3716_v11 = vld [vmem:[#allocation2 + $0x5b0] ss:$20 sps:$4 sm:$0xff]  }
 0x1d9   :  { %2322 = vmatprep.mubr.bf16.mxu0 %v3709_v28  ;;  %3250 = vmatprep.mubr.bf16.mxu1 %v3711_v17 }
 0x1db   :  { %v4173_v48 = vpop.f32.mrb[80].mxu1  ;;  %v2108_v1 = vpop.f32.mrb[40].mxu0 }
 0x1dc   :  { %4470 = vst [vmem:[#allocation23_spill] sm:$0xff] %v4173_v48  ;;  %v4176_v25 = vadd.f32 %v2108_v1, %v4053_v23  ;;  %v1917_v26 = vpop.f32.mrb[81].mxu1  ;;  %v2110_v50 = vpop.f32.mrb[41].mxu0 }
 0x1dd   :  { %v4178_v36 = vpop.f32.mrb[82].mxu1  ;;  %v2111_v38 = vpop.f32.mrb[42].mxu0  ;;  %v3717_v50 = vld [vmem:[#allocation2 + $0x5f8] ss:$20 sps:$4 sm:$0xff]  }
 0x1de   :  { %4471 = vst [vmem:[#allocation24_spill] sm:$0xff] %v4178_v36  ;;  %v4181_v9 = vadd.f32 %v2111_v38, %v4055_v27  ;;  %v1920_v28 = vpop.f32.mrb[83].mxu1  ;;  %v2113_v17 = vpop.f32.mrb[43].mxu0  ;;  %v3718_v36 = vld [vmem:[#allocation2 + $0x5d8] ss:$20 sps:$4 sm:$0xff]  }
 0x1df   :  { %v3719_v38 = vld [vmem:[#allocation2 + $0x624] ss:$20 sps:$4 sm:$0xff]   ;;  %v3721_v28 = vld [vmem:[#allocation2 + $0x600] ss:$20 sps:$4 sm:$0xff]  }
 0x1e0   :  { %2323 = vmatmul.mubr.bf16.gmra.mrb[148].mxu0 %v3712_v52  ;;  %3251 = vmatmul.mubr.bf16.gmra.mrb[188].mxu1 %v3713_v58 }
 0x1e1   :  { %2330 = vmatprep.mubr.bf16.mxu0 %v3714_v19  ;;  %3254 = vmatprep.mubr.bf16.mxu1 %v3716_v11 }
 0x1e3   :  { %v4183_v23 = vpop.f32.mrb[84].mxu1  ;;  %v2116_v10 = vpop.f32.mrb[44].mxu0 }
 0x1e4   :  { %4472 = vst [vmem:[#allocation25_spill] sm:$0xff] %v4183_v23  ;;  %v4186_v13 = vadd.f32 %v2116_v10, %v4057_v31  ;;  %v1925_v1 = vpop.f32.mrb[85].mxu1  ;;  %v2118_v26 = vpop.f32.mrb[45].mxu0 }
 0x1e5   :  { %v4188_v48 = vpop.f32.mrb[86].mxu1  ;;  %v2119_v27 = vpop.f32.mrb[46].mxu0  ;;  %v3722_v26 = vld [vmem:[#allocation2 + $0x620] ss:$20 sps:$4 sm:$0xff]  }
 0x1e6   :  { %4473 = vst [vmem:[#allocation26_spill] sm:$0xff] %v4188_v48  ;;  %v4191_v52 = vadd.f32 %v2119_v27, %v4059_v35  ;;  %v1928_v19 = vpop.f32.mrb[87].mxu1  ;;  %v2121_v58 = vpop.f32.mrb[47].mxu0  ;;  %v3723_v48 = vld [vmem:[#allocation2 + $0x628] ss:$20 sps:$4 sm:$0xff]  }
 0x1e8   :  { %2331 = vmatmul.mubr.bf16.gmra.mrb[152].mxu0 %v3717_v50  ;;  %3255 = vmatmul.mubr.bf16.gmra.mrb[192].mxu1 %v3718_v36 }
 0x1e9   :  { %2338 = vmatprep.mubr.bf16.mxu0 %v3719_v38  ;;  %3258 = vmatprep.mubr.bf16.mxu1 %v3721_v28 }
 0x1eb   :  { %v4193_v31 = vpop.f32.mrb[88].mxu1  ;;  %v2124_v11 = vpop.f32.mrb[48].mxu0 }
 0x1ec   :  { %v4196_v17 = vadd.f32 %v2124_v11, %v4061_v39  ;;  %v1933_v10 = vpop.f32.mrb[89].mxu1  ;;  %v2126_v1 = vpop.f32.mrb[49].mxu0 }
 0x1ed   :  { %v4198_v23 = vpop.f32.mrb[90].mxu1  ;;  %v2127_v35 = vpop.f32.mrb[50].mxu0 }
 0x1ee   :  { %v4201_v27 = vadd.f32 %v2127_v35, %v4063_v43  ;;  %v1936_v50 = vpop.f32.mrb[91].mxu1  ;;  %v2129_v36 = vpop.f32.mrb[51].mxu0 }
 0x1f0   :  { %2339 = vmatmul.mubr.bf16.gmra.mrb[156].mxu0 %v3722_v26  ;;  %3259 = vmatmul.mubr.bf16.gmra.mrb[196].mxu1 %v3723_v48 }
 0x1f3   :  { %v4203_v38 = vpop.f32.mrb[92].mxu1  ;;  %v2132_v28 = vpop.f32.mrb[52].mxu0 }
 0x1f4   :  { %4474 = vst [vmem:[#allocation27_spill] sm:$0xff] %v4203_v38  ;;  %v4206_v39 = vadd.f32 %v2132_v28, %v4065_v47  ;;  %v1941_v19 = vpop.f32.mrb[93].mxu1  ;;  %v2134_v58 = vpop.f32.mrb[53].mxu0 }
 0x1f5   :  { %v4208_v11 = vpop.f32.mrb[94].mxu1  ;;  %v2135_v10 = vpop.f32.mrb[54].mxu0 }
 0x1f6   :  { %4475 = vst [vmem:[#allocation28_spill] sm:$0xff] %v4208_v11  ;;  %v4211_v1 = vadd.f32 %v2135_v10, %v4067_v51  ;;  %v1944_v43 = vpop.f32.mrb[95].mxu1  ;;  %v2137_v35 = vpop.f32.mrb[55].mxu0 }
 0x1fb   :  { %v4213_v50 = vpop.f32.mrb[96].mxu1  ;;  %v2140_v26 = vpop.f32.mrb[56].mxu0 }
 0x1fc   :  { %4476 = vst [vmem:[#allocation29_spill] sm:$0xff] %v4213_v50  ;;  %v4216_v48 = vadd.f32 %v2140_v26, %v4069_v55  ;;  %v1949_v36 = vpop.f32.mrb[97].mxu1  ;;  %v2142_v38 = vpop.f32.mrb[57].mxu0 }
 0x1fd   :  { %v4218_v47 = vpop.f32.mrb[98].mxu1  ;;  %v2143_v28 = vpop.f32.mrb[58].mxu0 }
 0x1fe   :  { %4477 = vst [vmem:[#allocation30_spill] sm:$0xff] %v4218_v47  ;;  %v4221_v19 = vadd.f32 %v2143_v28, %v4071_v59  ;;  %v1952_v58 = vpop.f32.mrb[99].mxu1  ;;  %v2145_v11 = vpop.f32.mrb[59].mxu0 }
 0x203   :  { %v4223_v51 = vpop.f32.mrb[100].mxu1  ;;  %v2148_v10 = vpop.f32.mrb[60].mxu0 }
 0x204   :  { %4478 = vst [vmem:[#allocation31_spill] sm:$0xff] %v4223_v51  ;;  %v4226_v43 = vadd.f32 %v2148_v10, %v4073_v63  ;;  %v1957_v35 = vpop.f32.mrb[101].mxu1  ;;  %v2150_v50 = vpop.f32.mrb[61].mxu0 }
 0x205   :  { %v4228_v55 = vpop.f32.mrb[102].mxu1  ;;  %v2151_v26 = vpop.f32.mrb[62].mxu0 }
 0x206   :  { %4479 = vst [vmem:[#allocation32_spill] sm:$0xff] %v4228_v55  ;;  %v4231_v38 = vadd.f32 %v2151_v26, %v4075_v4  ;;  %v1960_v36 = vpop.f32.mrb[103].mxu1  ;;  %v2153_v47 = vpop.f32.mrb[63].mxu0 }
 0x20b   :  { %v4233_v59 = vpop.f32.mrb[104].mxu1  ;;  %v2156_v28 = vpop.f32.mrb[64].mxu0 }
 0x20c   :  { %4480 = vst [vmem:[#allocation33_spill] sm:$0xff] %v4233_v59  ;;  %v4236_v11 = vadd.f32 %v2156_v28, %v4077_v8  ;;  %v1965_v58 = vpop.f32.mrb[105].mxu1  ;;  %v2158_v51 = vpop.f32.mrb[65].mxu0 }
 0x20d   :  { %v4238_v63 = vpop.f32.mrb[106].mxu1  ;;  %v2159_v10 = vpop.f32.mrb[66].mxu0 }
 0x20e   :  { %4481 = vst [vmem:[#allocation34_spill] sm:$0xff] %v4238_v63  ;;  %v4241_v50 = vadd.f32 %v2159_v10, %v4079_v12  ;;  %v1968_v35 = vpop.f32.mrb[107].mxu1  ;;  %v2161_v55 = vpop.f32.mrb[67].mxu0 }
 0x213   :  { %v4243_v4 = vpop.f32.mrb[108].mxu1  ;;  %v2164_v26 = vpop.f32.mrb[68].mxu0 }
 0x214   :  { %4482 = vst [vmem:[#allocation35_spill] sm:$0xff] %v4243_v4  ;;  %v4246_v47 = vadd.f32 %v2164_v26, %v4081_v16  ;;  %v1973_v36 = vpop.f32.mrb[109].mxu1  ;;  %v2166_v59 = vpop.f32.mrb[69].mxu0 }
 0x215   :  { %v4248_v8 = vpop.f32.mrb[110].mxu1  ;;  %v2167_v28 = vpop.f32.mrb[70].mxu0 }
 0x216   :  { %4483 = vst [vmem:[#allocation36_spill] sm:$0xff] %v4248_v8  ;;  %v4251_v51 = vadd.f32 %v2167_v28, %v4083_v20  ;;  %v1976_v58 = vpop.f32.mrb[111].mxu1  ;;  %v2169_v63 = vpop.f32.mrb[71].mxu0 }
 0x21b   :  { %v4253_v12 = vpop.f32.mrb[112].mxu1  ;;  %v2172_v10 = vpop.f32.mrb[72].mxu0 }
 0x21c   :  { %4484 = vst [vmem:[#allocation37_spill] sm:$0xff] %v4253_v12  ;;  %v4256_v55 = vadd.f32 %v2172_v10, %v4085_v24  ;;  %v1981_v35 = vpop.f32.mrb[113].mxu1  ;;  %v2174_v4 = vpop.f32.mrb[73].mxu0 }
 0x21d   :  { %v4258_v16 = vpop.f32.mrb[114].mxu1  ;;  %v2175_v26 = vpop.f32.mrb[74].mxu0 }
 0x21e   :  { %4485 = vst [vmem:[#allocation38_spill] sm:$0xff] %v4258_v16  ;;  %v4261_v59 = vadd.f32 %v2175_v26, %v4087_v29  ;;  %v1984_v36 = vpop.f32.mrb[115].mxu1  ;;  %v2177_v8 = vpop.f32.mrb[75].mxu0 }
 0x223   :  { %v4263_v20 = vpop.f32.mrb[116].mxu1  ;;  %v2180_v28 = vpop.f32.mrb[76].mxu0 }
 0x224   :  { %4486 = vst [vmem:[#allocation39_spill] sm:$0xff] %v4263_v20  ;;  %v4266_v63 = vadd.f32 %v2180_v28, %v4089_v34  ;;  %v1989_v58 = vpop.f32.mrb[117].mxu1  ;;  %v2182_v12 = vpop.f32.mrb[77].mxu0 }
 0x225   :  { %v4268_v24 = vpop.f32.mrb[118].mxu1  ;;  %v2183_v10 = vpop.f32.mrb[78].mxu0 }
 0x226   :  { %4487 = vst [vmem:[#allocation40_spill] sm:$0xff] %v4268_v24  ;;  %v4271_v4 = vadd.f32 %v2183_v10, %v4091_v40  ;;  %v1992_v35 = vpop.f32.mrb[119].mxu1  ;;  %v2185_v16 = vpop.f32.mrb[79].mxu0 }
 0x22b   :  { %v2188_v29 = vpop.f32.mrb[80].mxu0  ;;  %v3184_v26 = vpop.f32.mrb[120].mxu1 }
 0x22c   :  { %v4274_v8 = vadd.f32 %v2188_v29, %v4093_v45  ;;  %v2390_v36 = vadd.f32 %v3184_v26, %v4103_v62  ;;  %v2190_v20 = vpop.f32.mrb[81].mxu0  ;;  %v2381_v34 = vpop.f32.mrb[121].mxu1 }
 0x22d   :  { %v2382_v28 = vadd.f32 %v2381_v34, %v4095_v46  ;;  %v2191_v12 = vpop.f32.mrb[82].mxu0  ;;  %v3185_v58 = vpop.f32.mrb[122].mxu1 }
 0x22e   :  { %3724 = vtanh.f32 %v2390_v36  ;;  %v4279_v24 = vadd.f32 %v2191_v12, %v4097_v53  ;;  %v2393_v40 = vadd.f32 %v3185_v58, %v4107_v7  ;;  %v2193_v16 = vpop.f32.mrb[83].mxu0  ;;  %v2384_v10 = vpop.f32.mrb[123].mxu1 }
 0x22f   :  { %3726 = vtanh.f32 %v2382_v28  ;;  %v2385_v45 = vadd.f32 %v2384_v10, %v4099_v54 }
 0x230   :  { %3728 = vtanh.f32 %v2393_v40 }
 0x231   :  { %3730 = vtanh.f32 %v2385_v45 }
 0x233   :  { %v2196_v62 = vpop.f32.mrb[84].mxu0  ;;  %v3188_v20 = vpop.f32.mrb[124].mxu1 }
 0x234   :  { %v4284_v35 = vadd.f32 %v2196_v62, %v4101_v61  ;;  %v2406_v46 = vadd.f32 %v3188_v20, %v4119_v33  ;;  %v2198_v29 = vpop.f32.mrb[85].mxu0  ;;  %v2397_v26 = vpop.f32.mrb[125].mxu1 }
 0x235   :  { %v2398_v53 = vadd.f32 %v2397_v26, %v4111_v15  ;;  %v2199_v36 = vpop.f32.mrb[86].mxu0  ;;  %v3189_v7 = vpop.f32.mrb[126].mxu1 }
 0x236   :  { %3732 = vtanh.f32 %v2406_v46  ;;  %v4289_v34 = vadd.f32 %v2199_v36, %v4105_v6  ;;  %v2409_v54 = vadd.f32 %v3189_v7, %v4123_v44  ;;  %v2201_v28 = vpop.f32.mrb[87].mxu0  ;;  %v2400_v12 = vpop.f32.mrb[127].mxu1 }
 0x237   :  { %3734 = vtanh.f32 %v2398_v53  ;;  %v2401_v61 = vadd.f32 %v2400_v12, %v4115_v0 }
 0x238   :  { %v3725_v58 = vpop.eup %3724  ;;  %3736 = vtanh.f32 %v2409_v54 }
 0x239   :  { %v3727_v33 = vpop.eup %3726  ;;  %2782 = vst [vmem:[#allocation7 + $0x10] sm:$0xff] %v3725_v58  ;;  %3738 = vtanh.f32 %v2401_v61 }
 0x23a   :  { %v3729_v40 = vpop.eup %3728  ;;  %2780 = vst [vmem:[#allocation7] sm:$0xff] %v3727_v33 }
 0x23b   :  { %v3731_v15 = vpop.eup %3730  ;;  %2783 = vst [vmem:[#allocation7 + $0x18] sm:$0xff] %v3729_v40  ;;  %v2204_v16 = vpop.f32.mrb[88].mxu0 }
 0x23c   :  { %v3192_v10 = vpop.f32.mrb[128].mxu1  ;;  %2781 = vst [vmem:[#allocation7 + $0x8] sm:$0xff] %v3731_v15  ;;  %v4294_v6 = vadd.f32 %v2204_v16, %v4109_v14  ;;  %v2206_v45 = vpop.f32.mrb[89].mxu0 }
 0x23d   :  { %v2422_v44 = vadd.f32 %v3192_v10, %v4135_v18  ;;  %v2413_v62 = vpop.f32.mrb[129].mxu1  ;;  %v2207_v20 = vpop.f32.mrb[90].mxu0 }
 0x23e   :  { %v2414_v0 = vadd.f32 %v2413_v62, %v4127_v57  ;;  %v3193_v46 = vpop.f32.mrb[130].mxu1  ;;  %v4299_v29 = vadd.f32 %v2207_v20, %v4113_v22  ;;  %v2209_v53 = vpop.f32.mrb[91].mxu0 }
 0x23f   :  { %3740 = vtanh.f32 %v2422_v44  ;;  %v2425_v26 = vadd.f32 %v3193_v46, %v4139_v30  ;;  %v2416_v36 = vpop.f32.mrb[131].mxu1 }
 0x240   :  { %3742 = vtanh.f32 %v2414_v0  ;;  %v2417_v14 = vadd.f32 %v2416_v36, %v4131_v5  ;;  %v3733_v7 = vpop.eup %3732 }
 0x241   :  { %3744 = vtanh.f32 %v2425_v26  ;;  %v3735_v18 = vpop.eup %3734  ;;  %2786 = vst [vmem:[#allocation7 + $0x30] sm:$0xff] %v3733_v7  ;;  %v4488_v7 = vld [vmem:[#allocation22_spill] sm:$0xff] }
 0x242   :  { %3746 = vtanh.f32 %v2417_v14  ;;  %v3737_v54 = vpop.eup %3736  ;;  %2784 = vst [vmem:[#allocation7 + $0x20] sm:$0xff] %v3735_v18 }
 0x243   :  { %v3739_v57 = vpop.eup %3738  ;;  %2787 = vst [vmem:[#allocation7 + $0x38] sm:$0xff] %v3737_v54  ;;  %v2212_v28 = vpop.f32.mrb[92].mxu0 }
 0x244   :  { %v3196_v12 = vpop.f32.mrb[132].mxu1  ;;  %2785 = vst [vmem:[#allocation7 + $0x28] sm:$0xff] %v3739_v57  ;;  %v4304_v22 = vadd.f32 %v2212_v28, %v4117_v32  ;;  %v2214_v61 = vpop.f32.mrb[93].mxu0  ;;  %v4489_v28 = vld [vmem:[#allocation19_spill] sm:$0xff] }
 0x245   :  { %v2438_v30 = vadd.f32 %v3196_v12, %v4151_v21  ;;  %v2429_v58 = vpop.f32.mrb[133].mxu1  ;;  %v2215_v33 = vpop.f32.mrb[94].mxu0 }
 0x246   :  { %v2430_v5 = vadd.f32 %v2429_v58, %v4143_v49  ;;  %v3197_v40 = vpop.f32.mrb[134].mxu1  ;;  %v4309_v15 = vadd.f32 %v2215_v33, %v4121_v42  ;;  %v2217_v10 = vpop.f32.mrb[95].mxu0 }
 0x247   :  { %3748 = vtanh.f32 %v2438_v30  ;;  %v2441_v16 = vadd.f32 %v3197_v40, %v4155_v41  ;;  %v2432_v44 = vpop.f32.mrb[135].mxu1 }
 0x248   :  { %3750 = vtanh.f32 %v2430_v5  ;;  %v2433_v32 = vadd.f32 %v2432_v44, %v4147_v2 }
 0x249   :  { %v3741_v45 = vpop.eup %3740  ;;  %3752 = vtanh.f32 %v2441_v16 }
 0x24a   :  { %v3743_v21 = vpop.eup %3742  ;;  %2790 = vst [vmem:[#allocation7 + $0x50] sm:$0xff] %v3741_v45  ;;  %3754 = vtanh.f32 %v2433_v32  ;;  %v4491_v45 = vld [vmem:[#allocation12_spill] sm:$0xff] }
 0x24b   :  { %v3745_v62 = vpop.eup %3744  ;;  %2788 = vst [vmem:[#allocation7 + $0x40] sm:$0xff] %v3743_v21  ;;  %v2220_v0 = vpop.f32.mrb[96].mxu0 }
 0x24c   :  { %v3747_v49 = vpop.eup %3746  ;;  %2791 = vst [vmem:[#allocation7 + $0x58] sm:$0xff] %v3745_v62  ;;  %v3200_v20 = vpop.f32.mrb[136].mxu1  ;;  %v4314_v42 = vadd.f32 %v2220_v0, %v4125_v56 }
 0x24d   :  { %2789 = vst [vmem:[#allocation7 + $0x48] sm:$0xff] %v3747_v49  ;;  %v2454_v41 = vadd.f32 %v3200_v20, %v4167_v37  ;;  %v2222_v46 = vpop.f32.mrb[97].mxu0  ;;  %v2445_v26 = vpop.f32.mrb[137].mxu1 }
 0x24e   :  { %v2446_v2 = vadd.f32 %v2445_v26, %v4159_v60  ;;  %v2223_v53 = vpop.f32.mrb[98].mxu0  ;;  %v3201_v36 = vpop.f32.mrb[138].mxu1 }
 0x24f   :  { %3756 = vtanh.f32 %v2454_v41  ;;  %v4319_v14 = vadd.f32 %v2223_v53, %v4129_v3  ;;  %v2457_v18 = vadd.f32 %v3201_v36, %v4488_v7  ;;  %v2225_v54 = vpop.f32.mrb[99].mxu0  ;;  %v2448_v57 = vpop.f32.mrb[139].mxu1  ;;  %v4490_v3 = vld [vmem:[#allocation11_spill] sm:$0xff]  ;;  %v4492_v53 = vld [vmem:[#allocation13_spill] sm:$0xff] }
 0x250   :  { %3758 = vtanh.f32 %v2446_v2  ;;  %v2449_v56 = vadd.f32 %v2448_v57, %v4489_v28  ;;  %v4493_v28 = vld [vmem:[#allocation14_spill] sm:$0xff] }
 0x251   :  { %v3749_v12 = vpop.eup %3748  ;;  %3760 = vtanh.f32 %v2457_v18 }
 0x252   :  { %v3751_v37 = vpop.eup %3750  ;;  %2794 = vst [vmem:[#allocation7 + $0x70] sm:$0xff] %v3749_v12  ;;  %3762 = vtanh.f32 %v2449_v56 }
 0x253   :  { %v3753_v30 = vpop.eup %3752  ;;  %2792 = vst [vmem:[#allocation7 + $0x60] sm:$0xff] %v3751_v37  ;;  %v2228_v61 = vpop.f32.mrb[100].mxu0 }
 0x254   :  { %v3755_v60 = vpop.eup %3754  ;;  %2795 = vst [vmem:[#allocation7 + $0x78] sm:$0xff] %v3753_v30  ;;  %v3204_v58 = vpop.f32.mrb[140].mxu1  ;;  %v4324_v5 = vadd.f32 %v2228_v61, %v4490_v3 }
 0x255   :  { %2793 = vst [vmem:[#allocation7 + $0x68] sm:$0xff] %v3755_v60  ;;  %v2470_v33 = vadd.f32 %v3204_v58, %v4186_v13  ;;  %v2230_v40 = vpop.f32.mrb[101].mxu0  ;;  %v2461_v16 = vpop.f32.mrb[141].mxu1 }
 0x256   :  { %v2462_v10 = vadd.f32 %v2461_v16, %v4176_v25  ;;  %v2231_v44 = vpop.f32.mrb[102].mxu0  ;;  %v3205_v32 = vpop.f32.mrb[142].mxu1  ;;  %v4494_v40 = vld [vmem:[#allocation15_spill] sm:$0xff] }
 0x257   :  { %3764 = vtanh.f32 %v2470_v33  ;;  %v4329_v21 = vadd.f32 %v2231_v44, %v4491_v45  ;;  %v2473_v62 = vadd.f32 %v3205_v32, %v4191_v52  ;;  %v2233_v49 = vpop.f32.mrb[103].mxu0  ;;  %v2464_v0 = vpop.f32.mrb[143].mxu1 }
 0x258   :  { %3766 = vtanh.f32 %v2462_v10  ;;  %v2465_v20 = vadd.f32 %v2464_v0, %v4181_v9 }
 0x259   :  { %v3757_v41 = vpop.eup %3756  ;;  %3768 = vtanh.f32 %v2473_v62  ;;  %v4495_v62 = vld [vmem:[#allocation16_spill] sm:$0xff] }
 0x25a   :  { %v3759_v13 = vpop.eup %3758  ;;  %2798 = vst [vmem:[#allocation7 + $0x90] sm:$0xff] %v3757_v41  ;;  %3770 = vtanh.f32 %v2465_v20 }
 0x25b   :  { %v3761_v46 = vpop.eup %3760  ;;  %2796 = vst [vmem:[#allocation7 + $0x80] sm:$0xff] %v3759_v13  ;;  %v2236_v26 = vpop.f32.mrb[104].mxu0 }
 0x25c   :  { %v3763_v25 = vpop.eup %3762  ;;  %2799 = vst [vmem:[#allocation7 + $0x98] sm:$0xff] %v3761_v46  ;;  %v3208_v2 = vpop.f32.mrb[144].mxu1  ;;  %v4334_v36 = vadd.f32 %v2236_v26, %v4492_v53  ;;  %v4496_v53 = vld [vmem:[#allocation17_spill] sm:$0xff] }
 0x25d   :  { %2797 = vst [vmem:[#allocation7 + $0x88] sm:$0xff] %v3763_v25  ;;  %v2486_v52 = vadd.f32 %v3208_v2, %v4206_v39  ;;  %v2238_v7 = vpop.f32.mrb[105].mxu0  ;;  %v2477_v18 = vpop.f32.mrb[145].mxu1 }
 0x25e   :  { %v2478_v9 = vadd.f32 %v2477_v18, %v4196_v17  ;;  %v2239_v54 = vpop.f32.mrb[106].mxu0  ;;  %v3209_v57 = vpop.f32.mrb[146].mxu1 }
 0x25f   :  { %3772 = vtanh.f32 %v2486_v52  ;;  %v4339_v56 = vadd.f32 %v2239_v54, %v4493_v28  ;;  %v2489_v12 = vadd.f32 %v3209_v57, %v4211_v1  ;;  %v2241_v37 = vpop.f32.mrb[107].mxu0  ;;  %v2480_v30 = vpop.f32.mrb[147].mxu1  ;;  %v4497_v57 = vld [vmem:[#allocation18_spill] sm:$0xff] }
 0x260   :  { %3774 = vtanh.f32 %v2478_v9  ;;  %v2481_v60 = vadd.f32 %v2480_v30, %v4201_v27 }
 0x261   :  { %v3765_v61 = vpop.eup %3764  ;;  %3776 = vtanh.f32 %v2489_v12 }
 0x262   :  { %v3767_v39 = vpop.eup %3766  ;;  %2802 = vst [vmem:[#allocation7 + $0xb0] sm:$0xff] %v3765_v61  ;;  %3778 = vtanh.f32 %v2481_v60 }
 0x263   :  { %v3769_v58 = vpop.eup %3768  ;;  %2800 = vst [vmem:[#allocation7 + $0xa0] sm:$0xff] %v3767_v39  ;;  %v2244_v3 = vpop.f32.mrb[108].mxu0 }
 0x264   :  { %v3771_v17 = vpop.eup %3770  ;;  %2803 = vst [vmem:[#allocation7 + $0xb8] sm:$0xff] %v3769_v58  ;;  %v3212_v33 = vpop.f32.mrb[148].mxu1  ;;  %v4344_v16 = vadd.f32 %v2244_v3, %v4494_v40  ;;  %v4498_v3 = vld [vmem:[#allocation20_spill] sm:$0xff] }
 0x265   :  { %2801 = vst [vmem:[#allocation7 + $0xa8] sm:$0xff] %v3771_v17  ;;  %v2502_v1 = vadd.f32 %v3212_v33, %v4226_v43  ;;  %v2246_v10 = vpop.f32.mrb[109].mxu0  ;;  %v2493_v44 = vpop.f32.mrb[149].mxu1 }
 0x266   :  { %v2494_v27 = vadd.f32 %v2493_v44, %v4216_v48  ;;  %v2247_v32 = vpop.f32.mrb[110].mxu0  ;;  %v3213_v45 = vpop.f32.mrb[150].mxu1 }
 0x267   :  { %3780 = vtanh.f32 %v2502_v1  ;;  %v4349_v49 = vadd.f32 %v2247_v32, %v4495_v62  ;;  %v2505_v0 = vadd.f32 %v3213_v45, %v4231_v38  ;;  %v2249_v20 = vpop.f32.mrb[111].mxu0  ;;  %v2496_v41 = vpop.f32.mrb[151].mxu1 }
 0x268   :  { %3782 = vtanh.f32 %v2494_v27  ;;  %v2497_v13 = vadd.f32 %v2496_v41, %v4221_v19  ;;  %v4499_v27 = vld [vmem:[#allocation21_spill] sm:$0xff] }
 0x269   :  { %v3773_v46 = vpop.eup %3772  ;;  %3784 = vtanh.f32 %v2505_v0 }
 0x26a   :  { %v3775_v43 = vpop.eup %3774  ;;  %2806 = vst [vmem:[#allocation7 + $0xd0] sm:$0xff] %v3773_v46  ;;  %3786 = vtanh.f32 %v2497_v13 }
 0x26b   :  { %v3777_v25 = vpop.eup %3776  ;;  %2804 = vst [vmem:[#allocation7 + $0xc0] sm:$0xff] %v3775_v43  ;;  %v2252_v26 = vpop.f32.mrb[112].mxu0 }
 0x26c   :  { %v3779_v48 = vpop.eup %3778  ;;  %2807 = vst [vmem:[#allocation7 + $0xd8] sm:$0xff] %v3777_v25  ;;  %v3216_v2 = vpop.f32.mrb[152].mxu1  ;;  %v4354_v52 = vadd.f32 %v2252_v26, %v4496_v53  ;;  %v4500_v25 = vld [vmem:[#allocation23_spill] sm:$0xff] }
 0x26d   :  { %2805 = vst [vmem:[#allocation7 + $0xc8] sm:$0xff] %v3779_v48  ;;  %v2518_v38 = vadd.f32 %v3216_v2, %v4246_v47  ;;  %v2254_v7 = vpop.f32.mrb[113].mxu0  ;;  %v2509_v18 = vpop.f32.mrb[153].mxu1 }
 0x26e   :  { %v2510_v19 = vadd.f32 %v2509_v18, %v4236_v11  ;;  %v2255_v9 = vpop.f32.mrb[114].mxu0  ;;  %v3217_v54 = vpop.f32.mrb[154].mxu1  ;;  %v4501_v7 = vld [vmem:[#allocation24_spill] sm:$0xff] }
 0x26f   :  { %3788 = vtanh.f32 %v2518_v38  ;;  %v4359_v28 = vadd.f32 %v2255_v9, %v4497_v57  ;;  %v2521_v12 = vadd.f32 %v3217_v54, %v4251_v51  ;;  %v2257_v37 = vpop.f32.mrb[115].mxu0  ;;  %v2512_v30 = vpop.f32.mrb[155].mxu1 }
 0x270   :  { %3790 = vtanh.f32 %v2510_v19  ;;  %v2513_v60 = vadd.f32 %v2512_v30, %v4241_v50 }
 0x271   :  { %v3781_v61 = vpop.eup %3780  ;;  %3792 = vtanh.f32 %v2521_v12 }
 0x272   :  { %v3783_v47 = vpop.eup %3782  ;;  %2810 = vst [vmem:[#allocation7 + $0xf0] sm:$0xff] %v3781_v61  ;;  %3794 = vtanh.f32 %v2513_v60  ;;  %v4502_v61 = vld [vmem:[#allocation25_spill] sm:$0xff] }
 0x273   :  { %v3785_v39 = vpop.eup %3784  ;;  %2808 = vst [vmem:[#allocation7 + $0xe0] sm:$0xff] %v3783_v47  ;;  %v2260_v58 = vpop.f32.mrb[116].mxu0 }
 0x274   :  { %v3787_v11 = vpop.eup %3786  ;;  %2811 = vst [vmem:[#allocation7 + $0xf8] sm:$0xff] %v3785_v39  ;;  %v3220_v17 = vpop.f32.mrb[156].mxu1  ;;  %v4364_v33 = vadd.f32 %v2260_v58, %v4498_v3  ;;  %v4503_v3 = vld [vmem:[#allocation26_spill] sm:$0xff] }
 0x275   :  { %2809 = vst [vmem:[#allocation7 + $0xe8] sm:$0xff] %v3787_v11  ;;  %v2534_v51 = vadd.f32 %v3220_v17, %v4266_v63  ;;  %v2262_v40 = vpop.f32.mrb[117].mxu0  ;;  %v2525_v1 = vpop.f32.mrb[157].mxu1 }
 0x276   :  { %v2526_v50 = vadd.f32 %v2525_v1, %v4256_v55  ;;  %v2263_v10 = vpop.f32.mrb[118].mxu0  ;;  %v3221_v44 = vpop.f32.mrb[158].mxu1 }
 0x277   :  { %3796 = vtanh.f32 %v2534_v51  ;;  %v4369_v32 = vadd.f32 %v2263_v10, %v4499_v27  ;;  %v2537_v45 = vadd.f32 %v3221_v44, %v4271_v4  ;;  %v2265_v62 = vpop.f32.mrb[119].mxu0  ;;  %v2528_v0 = vpop.f32.mrb[159].mxu1 }
 0x278   :  { %3798 = vtanh.f32 %v2526_v50  ;;  %v2529_v20 = vadd.f32 %v2528_v0, %v4261_v59 }
 0x279   :  { %v3789_v41 = vpop.eup %3788  ;;  %3800 = vtanh.f32 %v2537_v45 }
 0x27a   :  { %v3791_v63 = vpop.eup %3790  ;;  %2814 = vst [vmem:[#allocation7 + $0x110] sm:$0xff] %v3789_v41  ;;  %3802 = vtanh.f32 %v2529_v20 }
 0x27b   :  { %v3793_v13 = vpop.eup %3792  ;;  %2812 = vst [vmem:[#allocation7 + $0x100] sm:$0xff] %v3791_v63  ;;  %v2268_v46 = vpop.f32.mrb[120].mxu0 }
 0x27c   :  { %v3795_v55 = vpop.eup %3794  ;;  %2815 = vst [vmem:[#allocation7 + $0x118] sm:$0xff] %v3793_v13  ;;  %v3224_v43 = vpop.f32.mrb[160].mxu1  ;;  %v4374_v48 = vadd.f32 %v2268_v46, %v4500_v25 }
 0x27d   :  { %2813 = vst [vmem:[#allocation7 + $0x108] sm:$0xff] %v3795_v55  ;;  %v2550_v4 = vadd.f32 %v3224_v43, %v4284_v35  ;;  %v2270_v26 = vpop.f32.mrb[121].mxu0  ;;  %v2541_v2 = vpop.f32.mrb[161].mxu1 }
 0x27e   :  { %v2542_v59 = vadd.f32 %v2541_v2, %v4274_v8  ;;  %v2271_v53 = vpop.f32.mrb[122].mxu0  ;;  %v3225_v38 = vpop.f32.mrb[162].mxu1 }
 0x27f   :  { %3804 = vtanh.f32 %v2550_v4  ;;  %v4379_v18 = vadd.f32 %v2271_v53, %v4501_v7  ;;  %v2553_v19 = vadd.f32 %v3225_v38, %v4289_v34  ;;  %v2273_v9 = vpop.f32.mrb[123].mxu0  ;;  %v2544_v54 = vpop.f32.mrb[163].mxu1 }
 0x280   :  { %3806 = vtanh.f32 %v2542_v59  ;;  %v2545_v57 = vadd.f32 %v2544_v54, %v4279_v24  ;;  %v4505_v54 = vld [vmem:[#allocation28_spill] sm:$0xff] }
 0x281   :  { %v3797_v12 = vpop.eup %3796  ;;  %3808 = vtanh.f32 %v2553_v19 }
 0x282   :  { %v3799_v35 = vpop.eup %3798  ;;  %2818 = vst [vmem:[#allocation7 + $0x130] sm:$0xff] %v3797_v12  ;;  %3810 = vtanh.f32 %v2545_v57 }
 0x283   :  { %v3801_v37 = vpop.eup %3800  ;;  %2816 = vst [vmem:[#allocation7 + $0x120] sm:$0xff] %v3799_v35  ;;  %v2276_v30 = vpop.f32.mrb[124].mxu0 }
 0x284   :  { %v3803_v8 = vpop.eup %3802  ;;  %2819 = vst [vmem:[#allocation7 + $0x138] sm:$0xff] %v3801_v37  ;;  %v3228_v60 = vpop.f32.mrb[164].mxu1  ;;  %v4384_v47 = vadd.f32 %v2276_v30, %v4502_v61 }
 0x285   :  { %2817 = vst [vmem:[#allocation7 + $0x128] sm:$0xff] %v3803_v8  ;;  %v2566_v34 = vadd.f32 %v3228_v60, %v4304_v22  ;;  %v2278_v39 = vpop.f32.mrb[125].mxu0  ;;  %v2557_v11 = vpop.f32.mrb[165].mxu1 }
 0x286   :  { %v2558_v24 = vadd.f32 %v2557_v11, %v4294_v6  ;;  %v2279_v58 = vpop.f32.mrb[126].mxu0  ;;  %v3229_v17 = vpop.f32.mrb[166].mxu1  ;;  %v4506_v39 = vld [vmem:[#allocation29_spill] sm:$0xff] }
 0x287   :  { %3812 = vtanh.f32 %v2566_v34  ;;  %v4389_v51 = vadd.f32 %v2279_v58, %v4503_v3  ;;  %v2569_v40 = vadd.f32 %v3229_v17, %v4309_v15  ;;  %v2281_v1 = vpop.f32.mrb[127].mxu0  ;;  %v2560_v50 = vpop.f32.mrb[167].mxu1 }
 0x288   :  { %3814 = vtanh.f32 %v2558_v24  ;;  %v2561_v10 = vadd.f32 %v2560_v50, %v4299_v29 }
 0x289   :  { %v3805_v44 = vpop.eup %3804  ;;  %3816 = vtanh.f32 %v2569_v40  ;;  %v4507_v40 = vld [vmem:[#allocation30_spill] sm:$0xff] }
 0x28a   :  { %v3807_v22 = vpop.eup %3806  ;;  %2822 = vst [vmem:[#allocation7 + $0x150] sm:$0xff] %v3805_v44  ;;  %3818 = vtanh.f32 %v2561_v10 }
 0x28b   :  { %v3809_v27 = vpop.eup %3808  ;;  %2820 = vst [vmem:[#allocation7 + $0x140] sm:$0xff] %v3807_v22  ;;  %v2284_v45 = vpop.f32.mrb[128].mxu0 }
 0x28c   :  { %v3811_v6 = vpop.eup %3810  ;;  %2823 = vst [vmem:[#allocation7 + $0x158] sm:$0xff] %v3809_v27  ;;  %v3232_v62 = vpop.f32.mrb[168].mxu1  ;;  %v4394_v0 = vadd.f32 %v2284_v45, %v4193_v31 }
 0x28d   :  { %2821 = vst [vmem:[#allocation7 + $0x148] sm:$0xff] %v3811_v6  ;;  %v2582_v15 = vadd.f32 %v3232_v62, %v4324_v5  ;;  %v2286_v20 = vpop.f32.mrb[129].mxu0  ;;  %v2573_v41 = vpop.f32.mrb[169].mxu1 }
 0x28e   :  { %v2574_v29 = vadd.f32 %v2573_v41, %v4314_v42  ;;  %v2287_v63 = vpop.f32.mrb[130].mxu0  ;;  %v3233_v13 = vpop.f32.mrb[170].mxu1 }
 0x28f   :  { %3820 = vtanh.f32 %v2582_v15  ;;  %v4399_v55 = vadd.f32 %v2287_v63, %v4198_v23  ;;  %v2585_v46 = vadd.f32 %v3233_v13, %v4329_v21  ;;  %v2289_v43 = vpop.f32.mrb[131].mxu0  ;;  %v2576_v25 = vpop.f32.mrb[171].mxu1  ;;  %v4504_v23 = vld [vmem:[#allocation27_spill] sm:$0xff] }
 0x290   :  { %3822 = vtanh.f32 %v2574_v29  ;;  %v2577_v31 = vadd.f32 %v2576_v25, %v4319_v14  ;;  %v4508_v15 = vld [vmem:[#allocation31_spill] sm:$0xff] }
 0x291   :  { %v3813_v4 = vpop.eup %3812  ;;  %3824 = vtanh.f32 %v2585_v46  ;;  %v4509_v46 = vld [vmem:[#allocation32_spill] sm:$0xff] }
 0x292   :  { %v3815_v5 = vpop.eup %3814  ;;  %2826 = vst [vmem:[#allocation7 + $0x170] sm:$0xff] %v3813_v4  ;;  %3826 = vtanh.f32 %v2577_v31 }
 0x293   :  { %v3817_v26 = vpop.eup %3816  ;;  %2824 = vst [vmem:[#allocation7 + $0x160] sm:$0xff] %v3815_v5  ;;  %v2292_v2 = vpop.f32.mrb[132].mxu0 }
 0x294   :  { %v3819_v42 = vpop.eup %3818  ;;  %2827 = vst [vmem:[#allocation7 + $0x178] sm:$0xff] %v3817_v26  ;;  %v3236_v59 = vpop.f32.mrb[172].mxu1  ;;  %v4404_v53 = vadd.f32 %v2292_v2, %v4504_v23  ;;  %v4510_v23 = vld [vmem:[#allocation33_spill] sm:$0xff] }
 0x295   :  { %2825 = vst [vmem:[#allocation7 + $0x168] sm:$0xff] %v3819_v42  ;;  %v2598_v21 = vadd.f32 %v3236_v59, %v4344_v16  ;;  %v2294_v38 = vpop.f32.mrb[133].mxu0  ;;  %v2589_v7 = vpop.f32.mrb[173].mxu1 }
 0x296   :  { %v2590_v14 = vadd.f32 %v2589_v7, %v4334_v36  ;;  %v2295_v19 = vpop.f32.mrb[134].mxu0  ;;  %v3237_v9 = vpop.f32.mrb[174].mxu1 }
 0x297   :  { %3828 = vtanh.f32 %v2598_v21  ;;  %v4409_v57 = vadd.f32 %v2295_v19, %v4505_v54  ;;  %v2601_v12 = vadd.f32 %v3237_v9, %v4349_v49  ;;  %v2297_v35 = vpop.f32.mrb[135].mxu0  ;;  %v2592_v37 = vpop.f32.mrb[175].mxu1  ;;  %v4511_v9 = vld [vmem:[#allocation34_spill] sm:$0xff] }
 0x298   :  { %3830 = vtanh.f32 %v2590_v14  ;;  %v2593_v8 = vadd.f32 %v2592_v37, %v4339_v56 }
 0x299   :  { %v3821_v30 = vpop.eup %3820  ;;  %3832 = vtanh.f32 %v2601_v12 }
 0x29a   :  { %v3823_v16 = vpop.eup %3822  ;;  %2830 = vst [vmem:[#allocation7 + $0x190] sm:$0xff] %v3821_v30  ;;  %3834 = vtanh.f32 %v2593_v8 }
 0x29b   :  { %v3825_v60 = vpop.eup %3824  ;;  %2828 = vst [vmem:[#allocation7 + $0x180] sm:$0xff] %v3823_v16  ;;  %v2300_v61 = vpop.f32.mrb[136].mxu0 }
 0x29c   :  { %v3827_v36 = vpop.eup %3826  ;;  %2831 = vst [vmem:[#allocation7 + $0x198] sm:$0xff] %v3825_v60  ;;  %v3240_v34 = vpop.f32.mrb[176].mxu1  ;;  %v4414_v11 = vadd.f32 %v2300_v61, %v4506_v39  ;;  %v4512_v61 = vld [vmem:[#allocation35_spill] sm:$0xff] }
 0x29d   :  { %2829 = vst [vmem:[#allocation7 + $0x188] sm:$0xff] %v3827_v36  ;;  %v2614_v49 = vadd.f32 %v3240_v34, %v4364_v33  ;;  %v2302_v24 = vpop.f32.mrb[137].mxu0  ;;  %v2605_v58 = vpop.f32.mrb[177].mxu1 }
 0x29e   :  { %v2606_v56 = vadd.f32 %v2605_v58, %v4354_v52  ;;  %v2303_v17 = vpop.f32.mrb[138].mxu0  ;;  %v3241_v3 = vpop.f32.mrb[178].mxu1 }
 0x29f   :  { %3836 = vtanh.f32 %v2614_v49  ;;  %v4419_v1 = vadd.f32 %v2303_v17, %v4507_v40  ;;  %v2617_v50 = vadd.f32 %v3241_v3, %v4369_v32  ;;  %v2305_v10 = vpop.f32.mrb[139].mxu0  ;;  %v2608_v44 = vpop.f32.mrb[179].mxu1 }
 0x2a0   :  { %3838 = vtanh.f32 %v2606_v56  ;;  %v2609_v22 = vadd.f32 %v2608_v44, %v4359_v28  ;;  %v4513_v56 = vld [vmem:[#allocation36_spill] sm:$0xff] }
 0x2a1   :  { %v3829_v27 = vpop.eup %3828  ;;  %3840 = vtanh.f32 %v2617_v50 }
 0x2a2   :  { %v3831_v33 = vpop.eup %3830  ;;  %2834 = vst [vmem:[#allocation7 + $0x1b0] sm:$0xff] %v3829_v27  ;;  %3842 = vtanh.f32 %v2609_v22 }
 0x2a3   :  { %v3833_v6 = vpop.eup %3832  ;;  %2832 = vst [vmem:[#allocation7 + $0x1a0] sm:$0xff] %v3831_v33  ;;  %v2308_v45 = vpop.f32.mrb[140].mxu0 }
 0x2a4   :  { %v3835_v52 = vpop.eup %3834  ;;  %2835 = vst [vmem:[#allocation7 + $0x1b8] sm:$0xff] %v3833_v6  ;;  %v3244_v62 = vpop.f32.mrb[180].mxu1  ;;  %v2309_v20 = vadd.f32 %v2308_v45, %v4508_v15 }
 0x2a5   :  { %2833 = vst [vmem:[#allocation7 + $0x1a8] sm:$0xff] %v3835_v52  ;;  %v2630_v32 = vadd.f32 %v3244_v62, %v4384_v47  ;;  %v2310_v41 = vpop.f32.mrb[141].mxu0  ;;  %v2621_v29 = vpop.f32.mrb[181].mxu1  ;;  %v4514_v52 = vld [vmem:[#allocation37_spill] sm:$0xff] }
 0x2a6   :  { %v2622_v28 = vadd.f32 %v2621_v29, %v4374_v48  ;;  %v2311_v63 = vpop.f32.mrb[142].mxu0  ;;  %v3245_v13 = vpop.f32.mrb[182].mxu1  ;;  %v4515_v29 = vld [vmem:[#allocation38_spill] sm:$0xff] }
 0x2a7   :  { %3844 = vtanh.f32 %v2630_v32  ;;  %v2312_v43 = vadd.f32 %v2311_v63, %v4509_v46  ;;  %v2633_v25 = vadd.f32 %v3245_v13, %v4389_v51  ;;  %v2313_v31 = vpop.f32.mrb[143].mxu0  ;;  %v2624_v4 = vpop.f32.mrb[183].mxu1 }
 0x2a8   :  { %3846 = vtanh.f32 %v2622_v28  ;;  %v2625_v5 = vadd.f32 %v2624_v4, %v4379_v18 }
 0x2a9   :  { %v3837_v26 = vpop.eup %3836  ;;  %3848 = vtanh.f32 %v2633_v25 }
 0x2aa   :  { %v3839_v42 = vpop.eup %3838  ;;  %2838 = vst [vmem:[#allocation7 + $0x1d0] sm:$0xff] %v3837_v26  ;;  %3850 = vtanh.f32 %v2625_v5 }
 0x2ab   :  { %v3841_v47 = vpop.eup %3840  ;;  %2836 = vst [vmem:[#allocation7 + $0x1c0] sm:$0xff] %v3839_v42  ;;  %v2316_v2 = vpop.f32.mrb[144].mxu0 }
 0x2ac   :  { %v3843_v48 = vpop.eup %3842  ;;  %2839 = vst [vmem:[#allocation7 + $0x1d8] sm:$0xff] %v3841_v47  ;;  %v3248_v59 = vpop.f32.mrb[184].mxu1  ;;  %v2317_v21 = vadd.f32 %v2316_v2, %v4510_v23  ;;  %v4516_v47 = vld [vmem:[#allocation39_spill] sm:$0xff] }
 0x2ad   :  { %2837 = vst [vmem:[#allocation7 + $0x1c8] sm:$0xff] %v3843_v48  ;;  %v2646_v51 = vadd.f32 %v3248_v59, %v4404_v53  ;;  %v2318_v38 = vpop.f32.mrb[145].mxu0  ;;  %v2637_v7 = vpop.f32.mrb[185].mxu1 }
 0x2ae   :  { %v2638_v18 = vadd.f32 %v2637_v7, %v4394_v0  ;;  %v2319_v14 = vpop.f32.mrb[146].mxu0  ;;  %v3249_v19 = vpop.f32.mrb[186].mxu1  ;;  %v4517_v7 = vld [vmem:[#allocation40_spill] sm:$0xff] }
 0x2af   :  { %3852 = vtanh.f32 %v2646_v51  ;;  %v2320_v54 = vadd.f32 %v2319_v14, %v4511_v9  ;;  %v2649_v12 = vadd.f32 %v3249_v19, %v4409_v57  ;;  %v2321_v35 = vpop.f32.mrb[147].mxu0  ;;  %v2640_v37 = vpop.f32.mrb[187].mxu1 }
 0x2b0   :  { %3854 = vtanh.f32 %v2638_v18  ;;  %v2641_v8 = vadd.f32 %v2640_v37, %v4399_v55 }
 0x2b1   :  { %v3845_v30 = vpop.eup %3844  ;;  %3856 = vtanh.f32 %v2649_v12 }
 0x2b2   :  { %v3847_v16 = vpop.eup %3846  ;;  %2842 = vst [vmem:[#allocation7 + $0x1f0] sm:$0xff] %v3845_v30  ;;  %3858 = vtanh.f32 %v2641_v8 }
 0x2b3   :  { %v3849_v53 = vpop.eup %3848  ;;  %2840 = vst [vmem:[#allocation7 + $0x1e0] sm:$0xff] %v3847_v16  ;;  %v2324_v60 = vpop.f32.mrb[148].mxu0 }
 0x2b4   :  { %v3851_v0 = vpop.eup %3850  ;;  %2843 = vst [vmem:[#allocation7 + $0x1f8] sm:$0xff] %v3849_v53  ;;  %v3252_v36 = vpop.f32.mrb[188].mxu1  ;;  %v2325_v34 = vadd.f32 %v2324_v60, %v4512_v61 }
 0x2b5   :  { %2841 = vst [vmem:[#allocation7 + $0x1e8] sm:$0xff] %v3851_v0  ;;  %v2662_v57 = vadd.f32 %v3252_v36, %v2309_v20  ;;  %v2326_v39 = vpop.f32.mrb[149].mxu0  ;;  %v2653_v49 = vpop.f32.mrb[189].mxu1 }
 0x2b6   :  { %v2654_v24 = vadd.f32 %v2653_v49, %v4414_v11  ;;  %v2327_v55 = vpop.f32.mrb[150].mxu0  ;;  %v3253_v58 = vpop.f32.mrb[190].mxu1 }
 0x2b7   :  { %3860 = vtanh.f32 %v2662_v57  ;;  %v2328_v17 = vadd.f32 %v2327_v55, %v4513_v56  ;;  %v2665_v3 = vadd.f32 %v3253_v58, %v2312_v43  ;;  %v2329_v40 = vpop.f32.mrb[151].mxu0  ;;  %v2656_v50 = vpop.f32.mrb[191].mxu1 }
 0x2b8   :  { %3862 = vtanh.f32 %v2654_v24  ;;  %v2657_v10 = vadd.f32 %v2656_v50, %v4419_v1 }
 0x2b9   :  { %v3853_v44 = vpop.eup %3852  ;;  %3864 = vtanh.f32 %v2665_v3 }
 0x2ba   :  { %v3855_v22 = vpop.eup %3854  ;;  %2846 = vst [vmem:[#allocation7 + $0x210] sm:$0xff] %v3853_v44  ;;  %3866 = vtanh.f32 %v2657_v10 }
 0x2bb   :  { %v3857_v27 = vpop.eup %3856  ;;  %2844 = vst [vmem:[#allocation7 + $0x200] sm:$0xff] %v3855_v22  ;;  %v2332_v11 = vpop.f32.mrb[152].mxu0 }
 0x2bc   :  { %v3859_v33 = vpop.eup %3858  ;;  %2847 = vst [vmem:[#allocation7 + $0x218] sm:$0xff] %v3857_v27  ;;  %v3256_v6 = vpop.f32.mrb[192].mxu1  ;;  %v2333_v45 = vadd.f32 %v2332_v11, %v4514_v52 }
 0x2bd   :  { %2845 = vst [vmem:[#allocation7 + $0x208] sm:$0xff] %v3859_v33  ;;  %v2678_v62 = vadd.f32 %v3256_v6, %v2325_v34  ;;  %v2334_v15 = vpop.f32.mrb[153].mxu0  ;;  %v2669_v20 = vpop.f32.mrb[193].mxu1 }
 0x2be   :  { %v2670_v32 = vadd.f32 %v2669_v20, %v2317_v21  ;;  %v2335_v41 = vpop.f32.mrb[154].mxu0  ;;  %v3257_v1 = vpop.f32.mrb[194].mxu1 }
 0x2bf   :  { %3868 = vtanh.f32 %v2678_v62  ;;  %v2336_v28 = vadd.f32 %v2335_v41, %v4515_v29  ;;  %v2681_v63 = vadd.f32 %v3257_v1, %v2328_v17  ;;  %v2337_v13 = vpop.f32.mrb[155].mxu0  ;;  %v2672_v46 = vpop.f32.mrb[195].mxu1 }
 0x2c0   :  { %3870 = vtanh.f32 %v2670_v32  ;;  %v2673_v43 = vadd.f32 %v2672_v46, %v2320_v54 }
 0x2c1   :  { %v3861_v25 = vpop.eup %3860  ;;  %3872 = vtanh.f32 %v2681_v63 }
 0x2c2   :  { %v3863_v31 = vpop.eup %3862  ;;  %2850 = vst [vmem:[#allocation7 + $0x230] sm:$0xff] %v3861_v25  ;;  %3874 = vtanh.f32 %v2673_v43 }
 0x2c3   :  { %v3865_v4 = vpop.eup %3864  ;;  %2848 = vst [vmem:[#allocation7 + $0x220] sm:$0xff] %v3863_v31  ;;  %v2340_v26 = vpop.f32.mrb[156].mxu0 }
 0x2c4   :  { %v3867_v5 = vpop.eup %3866  ;;  %2851 = vst [vmem:[#allocation7 + $0x238] sm:$0xff] %v3865_v4  ;;  %v3260_v42 = vpop.f32.mrb[196].mxu1  ;;  %v2341_v48 = vadd.f32 %v2340_v26, %v4516_v47 }
 0x2c5   :  { %2849 = vst [vmem:[#allocation7 + $0x228] sm:$0xff] %v3867_v5  ;;  %v2342_v2 = vpop.f32.mrb[157].mxu0  ;;  %v2685_v59 = vpop.f32.mrb[197].mxu1 }
 0x2c6   :  { %v2686_v23 = vadd.f32 %v2685_v59, %v2333_v45  ;;  %v2343_v21 = vpop.f32.mrb[158].mxu0  ;;  %v3261_v51 = vpop.f32.mrb[198].mxu1  ;;  %v2694_v38 = vadd.f32 %v3260_v42, %v2341_v48 }
 0x2c7   :  { %v2344_v18 = vadd.f32 %v2343_v21, %v4517_v7  ;;  %v2345_v14 = vpop.f32.mrb[159].mxu0  ;;  %v2688_v19 = vpop.f32.mrb[199].mxu1 }
 0x2c8   :  { %3876 = vtanh.f32 %v2686_v23  ;;  %v2689_v9 = vadd.f32 %v2688_v19, %v2336_v28 }
 0x2c9   :  { %v3869_v54 = vpop.eup %3868  ;;  %3878 = vtanh.f32 %v2694_v38  ;;  %v2697_v12 = vadd.f32 %v3261_v51, %v2344_v18 }
 0x2ca   :  { %v3871_v35 = vpop.eup %3870  ;;  %2854 = vst [vmem:[#allocation7 + $0x250] sm:$0xff] %v3869_v54  ;;  %3880 = vtanh.f32 %v2689_v9 }
 0x2cb   :  { %v3873_v37 = vpop.eup %3872  ;;  %2852 = vst [vmem:[#allocation7 + $0x240] sm:$0xff] %v3871_v35  ;;  %3882 = vtanh.f32 %v2697_v12 }
 0x2cc   :  { %v3875_v8 = vpop.eup %3874  ;;  %2855 = vst [vmem:[#allocation7 + $0x258] sm:$0xff] %v3873_v37 }
 0x2cd   :  { %2853 = vst [vmem:[#allocation7 + $0x248] sm:$0xff] %v3875_v8 }
 0x2d2   :  { %v3877_v30 = vpop.eup %3876 }
 0x2d3   :  { %v3879_v16 = vpop.eup %3878  ;;  %2856 = vst [vmem:[#allocation7 + $0x260] sm:$0xff] %v3877_v30 }
 0x2d4   :  { %v3881_v53 = vpop.eup %3880  ;;  %2858 = vst [vmem:[#allocation7 + $0x270] sm:$0xff] %v3879_v16 }
 0x2d5   :  { %v3883_v0 = vpop.eup %3882  ;;  %2857 = vst [vmem:[#allocation7 + $0x268] sm:$0xff] %v3881_v53 }
 0x2d6   :  { %2859 = vst [vmem:[#allocation7 + $0x278] sm:$0xff] %v3883_v0 }
 0x2d7   :  { %3939 = shalt.err (!%p3936_p6)
}
 0x2d8   :  { %s3940_s12 = scalar_lea.hbm %s4457_s2, 10240 }
 0x2d9   :  { %p3941_p7 = scmp.ne.s32.totalorder %s4457_s2, %s3940_s12  ;;  %p3944_p8 = scmp.lt.u32.totalorder %s3940_s12, %s4457_s2 }
 0x2db   :  { %p3946_p9 = pnand %p3944_p8, %p3941_p7 }
 0x2dd   :  { %3949 = shalt.err (!%p3946_p9)
}
 0x2de   :  { %s3964_s17 = smov 128   ;;  %s3965_s18 = smov 8  }
 0x2df   :  { %2871 = dma.vmem_to_hbm [thread:$0]  %s2866_s8, 10240, %s4457_s2, [#allocation4], %s3964_s17, %s3964_s17, %s3965_s18  }
 0x2e0   :  { %3954 = dma.done.wait [#allocation4], 10240  }
 0x2e1   :  { %3955 = vsyncadd [#allocation4], 4294957056 }
 0x2e2   :  { %2875 = vsyncpa [#allocation3], 1 }
 0x2e3   :  { %2876 = vsyncpa [#allocation6], 1 }
 0x2e4   :  { %2877 = vsyncpa [#allocation4], 1 }

</bundles_post_ra>
